<compile_context>
chip_gen: v7x
topology: tpu7x:2x2x1
jax: 0.10.0
libtpu: 0.0.40
codegen_flags: <defaults>
</compile_context>

<pallas_src>
import math

import jax
import jax.numpy as jnp
import numpy as np
from jax.experimental import pallas as pl
from jax.experimental.pallas import tpu as pltpu

_EPS = 1e-5
_BN_SCALE = 1.0 / math.sqrt(1.0 + _EPS)   # eval-mode BatchNorm with running var = 1
_NEG = -1e30                              # "minus infinity" that stays NaN-free under (o - max(o))


def _elu(x):
    # ELU(alpha=1): x if x>0 else exp(x)-1   (matches torch.nn.ELU)
    return jnp.where(x > 0.0, x, jnp.exp(jnp.minimum(x, 0.0)) - 1.0)


def _kernel(edge_ref, node_ref, adjd_ref, adjdiag_ref, rowok_ref, edgediag_ref,
            pmask_ref, nmask_ref, invn_ref,
            w_edge_ref, w_node1_ref, w_node2_ref, beta_ref,
            w_nl_ref, b_nl_ref, w_w_ref, b_w_ref,
            s_ref, t_ref, t2_ref,
            out_ref):
    f32 = jnp.float32

    edge2 = edge_ref[0]          # (BB*E, HW)   rows (b, e)
    node0 = node_ref[0]          # (BB*C, H)    rows (b, c)
    adjd = adjd_ref[0]           # (BB, HW)     0/1 mask: adj == dilation
    adjdiag = adjdiag_ref[0]     # (BB, H)      its i == j diagonal
    rowok = rowok_ref[0]         # (BB, H)      1 where node i has at least one neighbour
    edgediag = edgediag_ref[0]   # (BB*E, H)    edge features on the i == j diagonal
    pmask = pmask_ref[0]         # (BB, HW)
    nmask = nmask_ref[0]         # (BB, H)
    invn = invn_ref[0]           # (BB, 1)      1 / node_mask.sum()

    BB, HW = adjd.shape
    H = nmask.shape[1]
    BC = node0.shape[0]          # BB * C
    C = BC // BB
    BNC = w_w_ref.shape[1]       # BB * NC

    dot = lambda a, b: jnp.dot(a, b, preferred_element_type=f32)

    S = s_ref[...]               # (HW, H)  per-i segment sum over j
    T = t_ref[...]               # (H, HW)  broadcast a j-indexed row across all i
    T2 = t2_ref[...]             # (H, HW)  broadcast an i-indexed row across all j

    # All edge-side 1x1 convs ([we1 | we2 | wce], block-diagonal over the BB samples): one matmul.
    dist_all = dot(w_edge_ref[...], edge2)        # (BB*(2C+1), HW)
    ddiag_all = dot(w_edge_ref[...], edgediag)    # (BB*(2C+1), H)  logits on the i == j diagonal

    adj3 = adjd[:, None, :]                       # (BB, 1, HW)
    adjdiag3 = adjdiag[:, None, :]                # (BB, 1, H)
    rowok3 = rowok[:, None, :]                    # (BB, 1, H)

    def gconv(dist, ddiag, w_node, beta, nodef):
        # dist (BB*C, HW) edge logits, ddiag (BB*C, H) their diagonal, nodef (BB*C, H).
        xij = dot(w_node, nodef)                  # (2*BB*C, H) = [wi @ node ; wj @ node], BN gamma folded
        xi = xij[:BC]
        xj = xij[BC:]
        # Lane-dense edge softmax over the W-long (b, c, i)-segments.  Softmax is invariant to
        # the per-segment shift, so the per-(b, c) max over all *valid* logits is used
        # (exp <= 1; only a >~88 spread between a segment's valid max and that global max
        # could underflow a whole segment - fine for realistic logit scales).
        o = jnp.where(adj3 > 0.0, dist.reshape(BB, C, HW), _NEG)
        m = jnp.max(o, axis=-1, keepdims=True)    # (BB, C, 1)
        ex = jnp.exp(o - m).reshape(BC, HW)       # masked entries -> exactly 0
        seg = dot(ex, S).reshape(BB, C, H)        # softmax denominators per (b, c, i)   [MXU]
        inv = jnp.where(seg > 0.0, rowok3 / seg, 0.0)      # nodes with no neighbour -> 0
        # sum_j ew[., i, j] * xj[., j]  ==  inv * sum_j ex[., i, j] * xj_tiled[., i, j]
        xj_t = dot(xj, T)                         # (BB*C, HW): xj broadcast across i      [MXU]
        term = dot(ex * xj_t, S).reshape(BB, C, H) * inv
        # diag(ew) straight from the diagonal logits, reusing m and the denominator.
        ewd = jnp.exp(jnp.where(adjdiag3 > 0.0, ddiag.reshape(BB, C, H), _NEG) - m) * inv
        x = term.reshape(BC, H) + ewd.reshape(BC, H) * (xi - xj)
        return _elu(x + beta)                     # eval BN: gamma folded into w_node, beta added here

    x1 = gconv(dist_all[:BC], ddiag_all[:BC], w_node1_ref[...], beta_ref[:, 0:1], node0)
    x2 = gconv(dist_all[BC:2 * BC], ddiag_all[BC:2 * BC], w_node2_ref[...], beta_ref[:, 1:2], x1)
    x = x2 + node0                                # residual (identity = node)

    # ---- NonLocal1d (g / theta / phi folded through concat_project in the wrapper) ----
    gtp = dot(w_nl_ref[...], x) + b_nl_ref[...]   # (BB*(NC+2), H): rows [g | phi-proj | theta-proj]
    g_x = gtp[:BNC]                               # (BB*NC, H)
    prow = gtp[BNC:BNC + BB]                      # (BB, H)  phi term, indexed by j
    tcol = gtp[BNC + BB:]                         # (BB, H)  theta term, indexed by i

    NC = BNC // BB
    g_m = (g_x.reshape(BB, NC, H) * nmask[:, None, :]).reshape(BNC, H)
    f = _elu(dist_all[2 * BC:] + dot(tcol, T2) + dot(prow, T)) * pmask      # (BB, HW)
    # TODO(synk): matches the reference - non-finite output if a sample's node_mask is all zeros.
    f_div = f * invn
    prod = (dot(g_m, T).reshape(BB, NC, HW) * f_div[:, None, :]).reshape(BNC, HW)
    y = dot(prod, S)                              # (BB*NC, H): y[b,n,i] = sum_j f_div * g_m
    wy = dot(w_w_ref[...], y) + b_w_ref[...]      # (BB*C, H), W-branch BN gamma folded in
    out_ref[0] = (wy + x).astype(out_ref.dtype)


def _step_vmem_bytes(BB, H, W, C, E, NC):
    """Rough per-grid-step VMEM footprint (double-buffered blocked inputs + constants + temps)."""
    HW = H * W
    blocked = BB * (E * HW + C * H + HW + H + H + E * H + HW + H + 1)
    out = BB * C * H
    consts = (BB * (2 * C + 1) * BB * E + 2 * (2 * BB * C) * (BB * C) + BB * C * 2
              + BB * (NC + 2) * BB * C + BB * (NC + 2) + BB * C * BB * NC + BB * C
              + 3 * HW * H)
    work = HW * BB * ((2 * C + 1) + 4 * C + 2 * NC + 4) + 8 * BB * C * H
    return 4 * (2 * (blocked + out) + consts + work)


def _pick_block_b(B, H, W, C, E, NC, budget_bytes=20 << 20):
    best = 1
    for d in range(1, B + 1):
        if B % d:
            continue
        if B >= 2 and B // d < 2:     # keep >=2 grid steps so both v7x TensorCores get work
            continue
        if _step_vmem_bytes(d, H, W, C, E, NC) <= budget_bytes:
            best = d
    return best


def graph_bottleneck_pallas(adj, edge, node, padding_mask, node_mask, params, block_b=None):
    B, H, W = adj.shape
    assert H == W, "adjacency must be square"
    C = node.shape[1]
    E = edge.shape[1]
    NC = params["wg"].shape[0]
    HW = H * W
    f32 = jnp.float32

    BB = _pick_block_b(B, H, W, C, E, NC) if block_b is None else block_b
    assert B % BB == 0
    G = B // BB

    # ---- wrapper-side prep: every reshape below is free (no transpose / extra HBM pass) ----
    edge_r = edge.astype(f32).reshape(G, BB * E, HW)
    node_r = node.astype(f32).reshape(G, BB * C, H)
    # TODO(synk): exact float compare + dilation=1 hardcoded, exactly as the reference GraphConv.
    adj_d = (adj == 1.0).astype(f32)
    adjd_r = adj_d.reshape(G, BB, HW)
    adjdiag_r = adj_d[:, jnp.arange(H), jnp.arange(H)].reshape(G, BB, H)
    rowok_r = (adj_d.sum(-1) > 0.0).astype(f32).reshape(G, BB, H)
    edgediag_r = edge.astype(f32)[:, :, jnp.arange(H), jnp.arange(H)].reshape(G, BB * E, H)
    pmask_r = padding_mask.astype(f32).reshape(G, BB, HW)
    nmask_r = node_mask.astype(f32).reshape(G, BB, H)
    # TODO(synk): matches the reference - NaN/inf if a sample's node_mask is all zeros.
    invn_r = (1.0 / node_mask.astype(f32).sum(axis=1)).reshape(G, BB, 1)

    # ---- fold / pack parameters, replicated block-diagonally over the BB samples in a step ----
    eye_bb = jnp.eye(BB, dtype=f32)
    kron = lambda w: jnp.kron(eye_bb, w.astype(f32))
    tile = lambda v: jnp.tile(v.astype(f32), (BB, 1))

    w_edge = jnp.concatenate([kron(params["we1"]), kron(params["we2"]), kron(params["wce"])], axis=0)
    # eval-mode BN: gamma / sqrt(var+eps) folded into the node convs (gconv output is linear in them)
    w_node1 = jnp.concatenate([kron(_BN_SCALE * params["g1"] * params["wi1"]),
                               kron(_BN_SCALE * params["g1"] * params["wj1"])], axis=0)
    w_node2 = jnp.concatenate([kron(_BN_SCALE * params["g2"] * params["wi2"]),
                               kron(_BN_SCALE * params["g2"] * params["wj2"])], axis=0)
    beta = jnp.concatenate([tile(params["be1"]), tile(params["be2"])], axis=1)           # (BB*C, 2)

    # NonLocal: fold theta/phi through concat_project -> single-row projections of x.
    a_t = params["wct"].T @ params["wt"]      # (1, C)
    a_p = params["wcp"] @ params["wp"]        # (1, C)
    b_t = params["wct"].T @ params["bt"]      # (1, 1)
    b_p = params["wcp"] @ params["bp"]        # (1, 1)
    w_nl = jnp.concatenate([kron(params["wg"]), kron(a_p), kron(a_t)], axis=0)           # (BB*(NC+2), BB*C)
    b_nl = jnp.concatenate([tile(params["bg"]), tile(b_p), tile(b_t)], axis=0)           # (BB*(NC+2), 1)
    w_w = kron(_BN_SCALE * params["gw"] * params["ww"])                                   # (BB*C, BB*NC)
    b_w = tile(params["bw"])                                                              # (BB*C, 1)

    # ---- tiny constant H*W <-> H segment-sum / tiling matrices (kept on the MXU side) ----
    eye_h = np.eye(H, dtype=np.float32)
    s_mat = jnp.asarray(np.kron(eye_h, np.ones((W, 1), np.float32)))     # (HW, H): sum over j per i
    t_mat = jnp.asarray(np.tile(np.eye(W, dtype=np.float32), (1, H)))    # (H, HW): broadcast over i
    t2_mat = jnp.asarray(np.kron(eye_h, np.ones((1, W), np.float32)))    # (H, HW): broadcast over j

    blocked = [edge_r, node_r, adjd_r, adjdiag_r, rowok_r, edgediag_r, pmask_r, nmask_r, invn_r]
    consts = [w_edge, w_node1, w_node2, beta, w_nl, b_nl, w_w, b_w, s_mat, t_mat, t2_mat]

    def blk_spec(a):
        rest = a.shape[1:]
        nd = len(rest)
        return pl.BlockSpec((1,) + rest, lambda g, nd=nd: (g,) + (0,) * nd)

    def full_spec(a):
        nd = a.ndim
        return pl.BlockSpec(a.shape, lambda g, nd=nd: (0,) * nd)

    in_specs = [blk_spec(a) for a in blocked] + [full_spec(a) for a in consts]
    out_specs = pl.BlockSpec((1, BB * C, H), lambda g: (g, 0, 0))

    need = _step_vmem_bytes(BB, H, W, C, E, NC)
    vmem_limit = int(min(max(2 * need, 32 << 20), 48 << 20))    # >= v5e's 16 MiB default, < v7x 64 MiB

    out = pl.pallas_call(
        _kernel,
        out_shape=jax.ShapeDtypeStruct((G, BB * C, H), f32),
        grid=(G,),
        in_specs=in_specs,
        out_specs=out_specs,
        compiler_params=pltpu.CompilerParams(
            dimension_semantics=("parallel",),
            vmem_limit_bytes=vmem_limit),
    )(*blocked, *consts)

    return out.reshape(B, C, H)   # free un-grouping back to (B, C, H)


def init_params(key, E, C, NC):
    keys = jax.random.split(key, 16)
    it = iter(keys)

    def rnd(shape, scale=0.3):
        return scale * jax.random.normal(next(it), shape, dtype=jnp.float32)

    return {
        # gc1 (GraphConv with node_nin = C, nout = C) + BatchNorm1d defaults
        "we1": rnd((C, E)), "wi1": rnd((C, C)), "wj1": rnd((C, C)),
        "g1": jnp.ones((C, 1), jnp.float32), "be1": jnp.zeros((C, 1), jnp.float32),
        # gc2
        "we2": rnd((C, E)), "wi2": rnd((C, C)), "wj2": rnd((C, C)),
        "g2": jnp.ones((C, 1), jnp.float32), "be2": jnp.zeros((C, 1), jnp.float32),
        # NonLocal1d g / theta / phi (Conv1d 1x1, bias=True)
        "wg": rnd((NC, C)), "bg": rnd((NC, 1), 0.1),
        "wt": rnd((NC, C)), "bt": rnd((NC, 1), 0.1),
        "wp": rnd((NC, C)), "bp": rnd((NC, 1), 0.1),
        # Affinity concat_project weight split: [edge | theta | phi] channels, bias=False
        "wce": rnd((1, E)), "wct": rnd((NC, 1)), "wcp": rnd((1, NC)),
        # NonLocal W: Conv1d(NC, C, bias=False) + BatchNorm1d initialized to zero (per __init__)
        "ww": rnd((C, NC)),
        "gw": jnp.zeros((C, 1), jnp.float32), "bw": jnp.zeros((C, 1), jnp.float32),
    }


def ref_forward(adj, edge, node, padding_mask, node_mask, p):
    """Pure-JAX reference (mirrors the PyTorch forward, eval-mode BN)."""
    B, H, W = adj.shape
    adj_d = (adj == 1.0).astype(jnp.float32)
    pmask = padding_mask.reshape(B, H, W)

    def gconv(we, wi, wj, gamma, beta, nodef):
        dist = jnp.einsum('oe,behw->bohw', we, edge)
        out = dist * adj_d[:, None]
        out = out + (-1e10) * (adj_d == 0.0).astype(jnp.float32)[:, None]
        m = out.max(-1, keepdims=True)
        ex = jnp.exp(out - m)
        ew = ex / ex.sum(-1, keepdims=True) * adj_d[:, None]
        nb = nodef[:, :, None, :] * adj_d[:, None, :, :]
        ci = jnp.einsum('oc,bchw->bohw', wi, nb)
        cj = jnp.einsum('oc,bchw->bohw', wj, nb)
        I = jnp.eye(W, dtype=jnp.float32)
        nf = I * ci + (1.0 - I) * cj
        x = (nf * ew).sum(-1)
        x = gamma[None] * (x * _BN_SCALE) + beta[None]
        return _elu(x)

    x1 = gconv(p['we1'], p['wi1'], p['wj1'], p['g1'], p['be1'], node)
    x2 = gconv(p['we2'], p['wi2'], p['wj2'], p['g2'], p['be2'], x1)
    x = x2 + node

    g_x = jnp.einsum('nc,bch->bnh', p['wg'], x) + p['bg'][None]
    g_x_t = jnp.swapaxes(g_x, 1, 2) * node_mask
    theta = jnp.einsum('nc,bch->bnh', p['wt'], x) + p['bt'][None]
    phi = jnp.einsum('nc,bch->bnh', p['wp'], x) + p['bp'][None]
    f = jnp.einsum('e,behw->bhw', p['wce'][0], edge)
    tcol = jnp.einsum('n,bnh->bh', p['wct'][:, 0], theta)
    prow = jnp.einsum('n,bnh->bh', p['wcp'][0], phi)
    f = f + tcol[:, :, None] + prow[:, None, :]
    f = _elu(f) * pmask
    nsum = node_mask.sum(axis=1)                      # (B, 1)
    f_div = f / nsum[:, :, None]
    y = jnp.einsum('bij,bjn->bin', f_div, g_x_t)      # (B, H, nc)
    wy = jnp.einsum('on,bhn->boh', p['ww'], y)
    wy = p['gw'][None] * (wy * _BN_SCALE) + p['bw'][None]
    return wy + x


if __name__ == "__main__":
    B, H, E, C, COMPRESS = 2, 16, 4, 8, 2    # batch, nodes, edge_nin, node_nin == nout, compress
    NC = C // COMPRESS

    key = jax.random.PRNGKey(0)
    k_adj, k_edge, k_node, k_pm, k_par, k_gw = jax.random.split(key, 6)

    adj = jax.random.randint(k_adj, (B, H, H), 0, 3).astype(jnp.float32)
    edge = jax.random.normal(k_edge, (B, E, H, H), dtype=jnp.float32)
    node = jax.random.normal(k_node, (B, C, H), dtype=jnp.float32)
    padding_mask = (jax.random.uniform(k_pm, (B, 1, H, H)) > 0.2).astype(jnp.float32)
    node_mask = jnp.ones((B, H, 1), jnp.float32).at[:, H - 2:, :].set(0.0)

    params = init_params(k_par, E, C, NC)
    # The module inits the NonLocal W-branch BatchNorm to zero, which would make that whole
    # path a numerical no-op; override with small nonzero values so the test exercises it.
    kg1, kg2 = jax.random.split(k_gw)
    params["gw"] = 0.3 * jax.random.normal(kg1, (C, 1), dtype=jnp.float32)
    params["bw"] = 0.1 * jax.random.normal(kg2, (C, 1), dtype=jnp.float32)

    out = graph_bottleneck_pallas(adj, edge, node, padding_mask, node_mask, params)
    out = jax.block_until_ready(out)

    ref = ref_forward(adj, edge, node, padding_mask, node_mask, params)
    assert out.shape == (B, C, H)
    np.testing.assert_allclose(np.asarray(out), np.asarray(ref), rtol=2e-4, atol=2e-4)

    print("KERNEL_OK")
</pallas_src>

<mosaic_0001>
module attributes {stable_mosaic.version = 11 : i64} {
  func.func @_kernel(%arg0: i32, %arg1: memref<1x4x256xf32, #tpu.memory_space<vmem>>, %arg2: memref<1x8x16xf32, #tpu.memory_space<vmem>>, %arg3: memref<1x1x256xf32, #tpu.memory_space<vmem>>, %arg4: memref<1x1x16xf32, #tpu.memory_space<vmem>>, %arg5: memref<1x1x16xf32, #tpu.memory_space<vmem>>, %arg6: memref<1x4x16xf32, #tpu.memory_space<vmem>>, %arg7: memref<1x1x256xf32, #tpu.memory_space<vmem>>, %arg8: memref<1x1x16xf32, #tpu.memory_space<vmem>>, %arg9: memref<1x1x1xf32, #tpu.memory_space<vmem>>, %arg10: memref<17x4xf32, #tpu.memory_space<vmem>>, %arg11: memref<16x8xf32, #tpu.memory_space<vmem>>, %arg12: memref<16x8xf32, #tpu.memory_space<vmem>>, %arg13: memref<8x2xf32, #tpu.memory_space<vmem>>, %arg14: memref<6x8xf32, #tpu.memory_space<vmem>>, %arg15: memref<6x1xf32, #tpu.memory_space<vmem>>, %arg16: memref<8x4xf32, #tpu.memory_space<vmem>>, %arg17: memref<8x1xf32, #tpu.memory_space<vmem>>, %arg18: memref<256x16xf32, #tpu.memory_space<vmem>>, %arg19: memref<16x256xf32, #tpu.memory_space<vmem>>, %arg20: memref<16x256xf32, #tpu.memory_space<vmem>>, %arg21: memref<1x8x16xf32, #tpu.memory_space<vmem>>) attributes {dimension_semantics = [#tpu.dimension_semantics<parallel>], iteration_bounds = array<i64: 2>, scalar_prefetch = 0 : i64, scratch_operands = 0 : i64, tpu.core_type = #tpu.core_type<tc>, window_params = [{transform_indices = @transform_0, window_bounds = array<i64: 1, 4, 256>}, {transform_indices = @transform_1, window_bounds = array<i64: 1, 8, 16>}, {transform_indices = @transform_2, window_bounds = array<i64: 1, 1, 256>}, {transform_indices = @transform_3, window_bounds = array<i64: 1, 1, 16>}, {transform_indices = @transform_4, window_bounds = array<i64: 1, 1, 16>}, {transform_indices = @transform_5, window_bounds = array<i64: 1, 4, 16>}, {transform_indices = @transform_6, window_bounds = array<i64: 1, 1, 256>}, {transform_indices = @transform_7, window_bounds = array<i64: 1, 1, 16>}, {transform_indices = @transform_8, window_bounds = array<i64: 1, 1, 1>}, {pipeline_mode = #tpu.pipeline_mode<synchronous>, transform_indices = @transform_9, window_bounds = array<i64: 17, 4>}, {pipeline_mode = #tpu.pipeline_mode<synchronous>, transform_indices = @transform_10, window_bounds = array<i64: 16, 8>}, {pipeline_mode = #tpu.pipeline_mode<synchronous>, transform_indices = @transform_11, window_bounds = array<i64: 16, 8>}, {pipeline_mode = #tpu.pipeline_mode<synchronous>, transform_indices = @transform_12, window_bounds = array<i64: 8, 2>}, {pipeline_mode = #tpu.pipeline_mode<synchronous>, transform_indices = @transform_13, window_bounds = array<i64: 6, 8>}, {pipeline_mode = #tpu.pipeline_mode<synchronous>, transform_indices = @transform_14, window_bounds = array<i64: 6, 1>}, {pipeline_mode = #tpu.pipeline_mode<synchronous>, transform_indices = @transform_15, window_bounds = array<i64: 8, 4>}, {pipeline_mode = #tpu.pipeline_mode<synchronous>, transform_indices = @transform_16, window_bounds = array<i64: 8, 1>}, {pipeline_mode = #tpu.pipeline_mode<synchronous>, transform_indices = @transform_17, window_bounds = array<i64: 256, 16>}, {pipeline_mode = #tpu.pipeline_mode<synchronous>, transform_indices = @transform_18, window_bounds = array<i64: 16, 256>}, {pipeline_mode = #tpu.pipeline_mode<synchronous>, transform_indices = @transform_19, window_bounds = array<i64: 16, 256>}, {transform_indices = @transform_20, window_bounds = array<i64: 1, 8, 16>}]} {
    %c0 = arith.constant 0 : index
    %c0_0 = arith.constant 0 : index
    %c0_1 = arith.constant 0 : index
    %0 = vector.load %arg1[%c0, %c0_0, %c0_1] : memref<1x4x256xf32, #tpu.memory_space<vmem>>, vector<1x4x256xf32>
    %1 = vector.shape_cast %0 : vector<1x4x256xf32> to vector<4x256xf32>
    %c0_2 = arith.constant 0 : index
    %c0_3 = arith.constant 0 : index
    %c0_4 = arith.constant 0 : index
    %2 = vector.load %arg2[%c0_2, %c0_3, %c0_4] : memref<1x8x16xf32, #tpu.memory_space<vmem>>, vector<1x8x16xf32>
    %3 = vector.shape_cast %2 : vector<1x8x16xf32> to vector<8x16xf32>
    %c0_5 = arith.constant 0 : index
    %c0_6 = arith.constant 0 : index
    %c0_7 = arith.constant 0 : index
    %4 = vector.load %arg3[%c0_5, %c0_6, %c0_7] : memref<1x1x256xf32, #tpu.memory_space<vmem>>, vector<1x1x256xf32>
    %5 = vector.shape_cast %4 : vector<1x1x256xf32> to vector<1x256xf32>
    %c0_8 = arith.constant 0 : index
    %c0_9 = arith.constant 0 : index
    %c0_10 = arith.constant 0 : index
    %6 = vector.load %arg4[%c0_8, %c0_9, %c0_10] : memref<1x1x16xf32, #tpu.memory_space<vmem>>, vector<1x1x16xf32>
    %7 = vector.shape_cast %6 : vector<1x1x16xf32> to vector<1x16xf32>
    %c0_11 = arith.constant 0 : index
    %c0_12 = arith.constant 0 : index
    %c0_13 = arith.constant 0 : index
    %8 = vector.load %arg5[%c0_11, %c0_12, %c0_13] : memref<1x1x16xf32, #tpu.memory_space<vmem>>, vector<1x1x16xf32>
    %9 = vector.shape_cast %8 : vector<1x1x16xf32> to vector<1x16xf32>
    %c0_14 = arith.constant 0 : index
    %c0_15 = arith.constant 0 : index
    %c0_16 = arith.constant 0 : index
    %10 = vector.load %arg6[%c0_14, %c0_15, %c0_16] : memref<1x4x16xf32, #tpu.memory_space<vmem>>, vector<1x4x16xf32>
    %11 = vector.shape_cast %10 : vector<1x4x16xf32> to vector<4x16xf32>
    %c0_17 = arith.constant 0 : index
    %c0_18 = arith.constant 0 : index
    %c0_19 = arith.constant 0 : index
    %12 = vector.load %arg7[%c0_17, %c0_18, %c0_19] : memref<1x1x256xf32, #tpu.memory_space<vmem>>, vector<1x1x256xf32>
    %13 = vector.shape_cast %12 : vector<1x1x256xf32> to vector<1x256xf32>
    %c0_20 = arith.constant 0 : index
    %c0_21 = arith.constant 0 : index
    %c0_22 = arith.constant 0 : index
    %14 = vector.load %arg8[%c0_20, %c0_21, %c0_22] : memref<1x1x16xf32, #tpu.memory_space<vmem>>, vector<1x1x16xf32>
    %15 = vector.shape_cast %14 : vector<1x1x16xf32> to vector<1x16xf32>
    %c0_23 = arith.constant 0 : index
    %c0_24 = arith.constant 0 : index
    %c0_25 = arith.constant 0 : index
    %16 = vector.load %arg9[%c0_23, %c0_24, %c0_25] : memref<1x1x1xf32, #tpu.memory_space<vmem>>, vector<1x1x1xf32>
    %17 = vector.shape_cast %16 : vector<1x1x1xf32> to vector<1x1xf32>
    %c0_26 = arith.constant 0 : index
    %c0_27 = arith.constant 0 : index
    %18 = vector.load %arg18[%c0_26, %c0_27] : memref<256x16xf32, #tpu.memory_space<vmem>>, vector<256x16xf32>
    %c0_28 = arith.constant 0 : index
    %c0_29 = arith.constant 0 : index
    %19 = vector.load %arg19[%c0_28, %c0_29] : memref<16x256xf32, #tpu.memory_space<vmem>>, vector<16x256xf32>
    %c0_30 = arith.constant 0 : index
    %c0_31 = arith.constant 0 : index
    %20 = vector.load %arg20[%c0_30, %c0_31] : memref<16x256xf32, #tpu.memory_space<vmem>>, vector<16x256xf32>
    %c0_32 = arith.constant 0 : index
    %c0_33 = arith.constant 0 : index
    %21 = vector.load %arg10[%c0_32, %c0_33] : memref<17x4xf32, #tpu.memory_space<vmem>>, vector<17x4xf32>
    %cst = arith.constant dense<0.000000e+00> : vector<17x256xf32>
    %22 = tpu.matmul %21, %1, %cst {dimension_numbers = #tpu.dot_dimension_numbers<[1], [0], [0], [1], [0, 0, 1, 1], [], []>} : vector<17x4xf32>, vector<4x256xf32>, vector<17x256xf32> -> vector<17x256xf32>
    %c0_34 = arith.constant 0 : index
    %c0_35 = arith.constant 0 : index
    %23 = vector.load %arg10[%c0_34, %c0_35] : memref<17x4xf32, #tpu.memory_space<vmem>>, vector<17x4xf32>
    %cst_36 = arith.constant dense<0.000000e+00> : vector<17x16xf32>
    %24 = tpu.matmul %23, %11, %cst_36 {dimension_numbers = #tpu.dot_dimension_numbers<[1], [0], [0], [1], [0, 0, 1, 1], [], []>} : vector<17x4xf32>, vector<4x16xf32>, vector<17x16xf32> -> vector<17x16xf32>
    %25 = vector.shape_cast %5 : vector<1x256xf32> to vector<1x1x256xf32>
    %26 = vector.shape_cast %7 : vector<1x16xf32> to vector<1x1x16xf32>
    %27 = vector.shape_cast %9 : vector<1x16xf32> to vector<1x1x16xf32>
    %28 = vector.extract_strided_slice %22 {offsets = [0, 0], sizes = [8, 256], strides = [1, 1]} : vector<17x256xf32> to vector<8x256xf32>
    %29 = vector.extract_strided_slice %24 {offsets = [0, 0], sizes = [8, 16], strides = [1, 1]} : vector<17x16xf32> to vector<8x16xf32>
    %c0_37 = arith.constant 0 : index
    %c0_38 = arith.constant 0 : index
    %30 = vector.load %arg11[%c0_37, %c0_38] : memref<16x8xf32, #tpu.memory_space<vmem>>, vector<16x8xf32>
    %c0_39 = arith.constant 0 : index
    %c0_40 = arith.constant 0 : index
    %31 = vector.load %arg13[%c0_39, %c0_40] : memref<8x2xf32, #tpu.memory_space<vmem>>, vector<8x1xf32>
    %cst_41 = arith.constant dense<0.000000e+00> : vector<16x16xf32>
    %32 = tpu.matmul %30, %3, %cst_41 {dimension_numbers = #tpu.dot_dimension_numbers<[1], [0], [0], [1], [0, 0, 1, 1], [], []>} : vector<16x8xf32>, vector<8x16xf32>, vector<16x16xf32> -> vector<16x16xf32>
    %33 = vector.extract_strided_slice %32 {offsets = [0, 0], sizes = [8, 16], strides = [1, 1]} : vector<16x16xf32> to vector<8x16xf32>
    %34 = vector.extract_strided_slice %32 {offsets = [8, 0], sizes = [8, 16], strides = [1, 1]} : vector<16x16xf32> to vector<8x16xf32>
    %cst_42 = arith.constant 0.000000e+00 : f32
    %35 = vector.broadcast %cst_42 : f32 to vector<1x1x256xf32>
    %36 = arith.cmpf ogt, %25, %35 : vector<1x1x256xf32>
    %37 = vector.shape_cast %28 : vector<8x256xf32> to vector<1x8x256xf32>
    %cst_43 = arith.constant -1.000000e+30 : f32
    %38 = vector.shape_cast %36 : vector<1x1x256xi1> to vector<1x1x256xi1>
    %39 = vector.broadcast %38 : vector<1x1x256xi1> to vector<1x8x256xi1>
    %40 = vector.broadcast %cst_43 : f32 to vector<1x8x256xf32>
    %41 = arith.select %39, %37, %40 : vector<1x8x256xi1>, vector<1x8x256xf32>
    %cst_44 = arith.constant dense<0xFF800000> : vector<1x8xf32>
    %42 = vector.multi_reduction <maximumf>, %41, %cst_44 [2] : vector<1x8x256xf32> to vector<1x8xf32>
    %43 = vector.shape_cast %42 : vector<1x8xf32> to vector<1x8x1xf32>
    %44 = vector.broadcast %43 : vector<1x8x1xf32> to vector<1x8x256xf32>
    %45 = arith.subf %41, %44 : vector<1x8x256xf32>
    %46 = math.exp %45 : vector<1x8x256xf32>
    %47 = vector.shape_cast %46 : vector<1x8x256xf32> to vector<8x256xf32>
    %cst_45 = arith.constant dense<0.000000e+00> : vector<8x16xf32>
    %48 = tpu.matmul %47, %18, %cst_45 {dimension_numbers = #tpu.dot_dimension_numbers<[1], [0], [0], [1], [0, 0, 1, 1], [], []>} : vector<8x256xf32>, vector<256x16xf32>, vector<8x16xf32> -> vector<8x16xf32>
    %49 = vector.shape_cast %48 : vector<8x16xf32> to vector<1x8x16xf32>
    %cst_46 = arith.constant 0.000000e+00 : f32
    %50 = vector.broadcast %cst_46 : f32 to vector<1x8x16xf32>
    %51 = arith.cmpf ogt, %49, %50 : vector<1x8x16xf32>
    %52 = vector.broadcast %27 : vector<1x1x16xf32> to vector<1x8x16xf32>
    %53 = arith.divf %52, %49 : vector<1x8x16xf32>
    %cst_47 = arith.constant 0.000000e+00 : f32
    %54 = vector.broadcast %cst_47 : f32 to vector<1x8x16xf32>
    %55 = arith.select %51, %53, %54 : vector<1x8x16xi1>, vector<1x8x16xf32>
    %cst_48 = arith.constant dense<0.000000e+00> : vector<8x256xf32>
    %56 = tpu.matmul %34, %19, %cst_48 {dimension_numbers = #tpu.dot_dimension_numbers<[1], [0], [0], [1], [0, 0, 1, 1], [], []>} : vector<8x16xf32>, vector<16x256xf32>, vector<8x256xf32> -> vector<8x256xf32>
    %57 = arith.mulf %47, %56 : vector<8x256xf32>
    %cst_49 = arith.constant dense<0.000000e+00> : vector<8x16xf32>
    %58 = tpu.matmul %57, %18, %cst_49 {dimension_numbers = #tpu.dot_dimension_numbers<[1], [0], [0], [1], [0, 0, 1, 1], [], []>} : vector<8x256xf32>, vector<256x16xf32>, vector<8x16xf32> -> vector<8x16xf32>
    %59 = vector.shape_cast %58 : vector<8x16xf32> to vector<1x8x16xf32>
    %60 = arith.mulf %59, %55 : vector<1x8x16xf32>
    %cst_50 = arith.constant 0.000000e+00 : f32
    %61 = vector.broadcast %cst_50 : f32 to vector<1x1x16xf32>
    %62 = arith.cmpf ogt, %26, %61 : vector<1x1x16xf32>
    %63 = vector.shape_cast %29 : vector<8x16xf32> to vector<1x8x16xf32>
    %cst_51 = arith.constant -1.000000e+30 : f32
    %64 = vector.shape_cast %62 : vector<1x1x16xi1> to vector<1x1x16xi1>
    %65 = vector.broadcast %64 : vector<1x1x16xi1> to vector<1x8x16xi1>
    %66 = vector.broadcast %cst_51 : f32 to vector<1x8x16xf32>
    %67 = arith.select %65, %63, %66 : vector<1x8x16xi1>, vector<1x8x16xf32>
    %68 = vector.broadcast %43 : vector<1x8x1xf32> to vector<1x8x16xf32>
    %69 = arith.subf %67, %68 : vector<1x8x16xf32>
    %70 = math.exp %69 : vector<1x8x16xf32>
    %71 = arith.mulf %70, %55 : vector<1x8x16xf32>
    %72 = vector.shape_cast %60 : vector<1x8x16xf32> to vector<8x16xf32>
    %73 = vector.shape_cast %71 : vector<1x8x16xf32> to vector<8x16xf32>
    %74 = arith.subf %33, %34 : vector<8x16xf32>
    %75 = arith.mulf %73, %74 : vector<8x16xf32>
    %76 = arith.addf %72, %75 : vector<8x16xf32>
    %77 = vector.broadcast %31 : vector<8x1xf32> to vector<8x16xf32>
    %78 = arith.addf %76, %77 : vector<8x16xf32>
    %cst_52 = arith.constant 0.000000e+00 : f32
    %79 = vector.broadcast %cst_52 : f32 to vector<8x16xf32>
    %80 = arith.cmpf ogt, %78, %79 : vector<8x16xf32>
    %cst_53 = arith.constant 0.000000e+00 : f32
    %81 = vector.broadcast %cst_53 : f32 to vector<8x16xf32>
    %82 = arith.minimumf %78, %81 : vector<8x16xf32>
    %83 = math.exp %82 : vector<8x16xf32>
    %cst_54 = arith.constant 1.000000e+00 : f32
    %84 = vector.broadcast %cst_54 : f32 to vector<8x16xf32>
    %85 = arith.subf %83, %84 : vector<8x16xf32>
    %86 = arith.select %80, %78, %85 : vector<8x16xi1>, vector<8x16xf32>
    %87 = vector.extract_strided_slice %22 {offsets = [8, 0], sizes = [8, 256], strides = [1, 1]} : vector<17x256xf32> to vector<8x256xf32>
    %88 = vector.extract_strided_slice %24 {offsets = [8, 0], sizes = [8, 16], strides = [1, 1]} : vector<17x16xf32> to vector<8x16xf32>
    %c0_55 = arith.constant 0 : index
    %c0_56 = arith.constant 0 : index
    %89 = vector.load %arg12[%c0_55, %c0_56] : memref<16x8xf32, #tpu.memory_space<vmem>>, vector<16x8xf32>
    %c0_57 = arith.constant 0 : index
    %c1 = arith.constant 1 : index
    %90 = vector.load %arg13[%c0_57, %c1] : memref<8x2xf32, #tpu.memory_space<vmem>>, vector<8x1xf32>
    %cst_58 = arith.constant dense<0.000000e+00> : vector<16x16xf32>
    %91 = tpu.matmul %89, %86, %cst_58 {dimension_numbers = #tpu.dot_dimension_numbers<[1], [0], [0], [1], [0, 0, 1, 1], [], []>} : vector<16x8xf32>, vector<8x16xf32>, vector<16x16xf32> -> vector<16x16xf32>
    %92 = vector.extract_strided_slice %91 {offsets = [0, 0], sizes = [8, 16], strides = [1, 1]} : vector<16x16xf32> to vector<8x16xf32>
    %93 = vector.extract_strided_slice %91 {offsets = [8, 0], sizes = [8, 16], strides = [1, 1]} : vector<16x16xf32> to vector<8x16xf32>
    %cst_59 = arith.constant 0.000000e+00 : f32
    %94 = vector.broadcast %cst_59 : f32 to vector<1x1x256xf32>
    %95 = arith.cmpf ogt, %25, %94 : vector<1x1x256xf32>
    %96 = vector.shape_cast %87 : vector<8x256xf32> to vector<1x8x256xf32>
    %cst_60 = arith.constant -1.000000e+30 : f32
    %97 = vector.shape_cast %95 : vector<1x1x256xi1> to vector<1x1x256xi1>
    %98 = vector.broadcast %97 : vector<1x1x256xi1> to vector<1x8x256xi1>
    %99 = vector.broadcast %cst_60 : f32 to vector<1x8x256xf32>
    %100 = arith.select %98, %96, %99 : vector<1x8x256xi1>, vector<1x8x256xf32>
    %cst_61 = arith.constant dense<0xFF800000> : vector<1x8xf32>
    %101 = vector.multi_reduction <maximumf>, %100, %cst_61 [2] : vector<1x8x256xf32> to vector<1x8xf32>
    %102 = vector.shape_cast %101 : vector<1x8xf32> to vector<1x8x1xf32>
    %103 = vector.broadcast %102 : vector<1x8x1xf32> to vector<1x8x256xf32>
    %104 = arith.subf %100, %103 : vector<1x8x256xf32>
    %105 = math.exp %104 : vector<1x8x256xf32>
    %106 = vector.shape_cast %105 : vector<1x8x256xf32> to vector<8x256xf32>
    %cst_62 = arith.constant dense<0.000000e+00> : vector<8x16xf32>
    %107 = tpu.matmul %106, %18, %cst_62 {dimension_numbers = #tpu.dot_dimension_numbers<[1], [0], [0], [1], [0, 0, 1, 1], [], []>} : vector<8x256xf32>, vector<256x16xf32>, vector<8x16xf32> -> vector<8x16xf32>
    %108 = vector.shape_cast %107 : vector<8x16xf32> to vector<1x8x16xf32>
    %cst_63 = arith.constant 0.000000e+00 : f32
    %109 = vector.broadcast %cst_63 : f32 to vector<1x8x16xf32>
    %110 = arith.cmpf ogt, %108, %109 : vector<1x8x16xf32>
    %111 = vector.broadcast %27 : vector<1x1x16xf32> to vector<1x8x16xf32>
    %112 = arith.divf %111, %108 : vector<1x8x16xf32>
    %cst_64 = arith.constant 0.000000e+00 : f32
    %113 = vector.broadcast %cst_64 : f32 to vector<1x8x16xf32>
    %114 = arith.select %110, %112, %113 : vector<1x8x16xi1>, vector<1x8x16xf32>
    %cst_65 = arith.constant dense<0.000000e+00> : vector<8x256xf32>
    %115 = tpu.matmul %93, %19, %cst_65 {dimension_numbers = #tpu.dot_dimension_numbers<[1], [0], [0], [1], [0, 0, 1, 1], [], []>} : vector<8x16xf32>, vector<16x256xf32>, vector<8x256xf32> -> vector<8x256xf32>
    %116 = arith.mulf %106, %115 : vector<8x256xf32>
    %cst_66 = arith.constant dense<0.000000e+00> : vector<8x16xf32>
    %117 = tpu.matmul %116, %18, %cst_66 {dimension_numbers = #tpu.dot_dimension_numbers<[1], [0], [0], [1], [0, 0, 1, 1], [], []>} : vector<8x256xf32>, vector<256x16xf32>, vector<8x16xf32> -> vector<8x16xf32>
    %118 = vector.shape_cast %117 : vector<8x16xf32> to vector<1x8x16xf32>
    %119 = arith.mulf %118, %114 : vector<1x8x16xf32>
    %cst_67 = arith.constant 0.000000e+00 : f32
    %120 = vector.broadcast %cst_67 : f32 to vector<1x1x16xf32>
    %121 = arith.cmpf ogt, %26, %120 : vector<1x1x16xf32>
    %122 = vector.shape_cast %88 : vector<8x16xf32> to vector<1x8x16xf32>
    %cst_68 = arith.constant -1.000000e+30 : f32
    %123 = vector.shape_cast %121 : vector<1x1x16xi1> to vector<1x1x16xi1>
    %124 = vector.broadcast %123 : vector<1x1x16xi1> to vector<1x8x16xi1>
    %125 = vector.broadcast %cst_68 : f32 to vector<1x8x16xf32>
    %126 = arith.select %124, %122, %125 : vector<1x8x16xi1>, vector<1x8x16xf32>
    %127 = vector.broadcast %102 : vector<1x8x1xf32> to vector<1x8x16xf32>
    %128 = arith.subf %126, %127 : vector<1x8x16xf32>
    %129 = math.exp %128 : vector<1x8x16xf32>
    %130 = arith.mulf %129, %114 : vector<1x8x16xf32>
    %131 = vector.shape_cast %119 : vector<1x8x16xf32> to vector<8x16xf32>
    %132 = vector.shape_cast %130 : vector<1x8x16xf32> to vector<8x16xf32>
    %133 = arith.subf %92, %93 : vector<8x16xf32>
    %134 = arith.mulf %132, %133 : vector<8x16xf32>
    %135 = arith.addf %131, %134 : vector<8x16xf32>
    %136 = vector.broadcast %90 : vector<8x1xf32> to vector<8x16xf32>
    %137 = arith.addf %135, %136 : vector<8x16xf32>
    %cst_69 = arith.constant 0.000000e+00 : f32
    %138 = vector.broadcast %cst_69 : f32 to vector<8x16xf32>
    %139 = arith.cmpf ogt, %137, %138 : vector<8x16xf32>
    %cst_70 = arith.constant 0.000000e+00 : f32
    %140 = vector.broadcast %cst_70 : f32 to vector<8x16xf32>
    %141 = arith.minimumf %137, %140 : vector<8x16xf32>
    %142 = math.exp %141 : vector<8x16xf32>
    %cst_71 = arith.constant 1.000000e+00 : f32
    %143 = vector.broadcast %cst_71 : f32 to vector<8x16xf32>
    %144 = arith.subf %142, %143 : vector<8x16xf32>
    %145 = arith.select %139, %137, %144 : vector<8x16xi1>, vector<8x16xf32>
    %146 = arith.addf %145, %3 : vector<8x16xf32>
    %c0_72 = arith.constant 0 : index
    %c0_73 = arith.constant 0 : index
    %147 = vector.load %arg14[%c0_72, %c0_73] : memref<6x8xf32, #tpu.memory_space<vmem>>, vector<6x8xf32>
    %cst_74 = arith.constant dense<0.000000e+00> : vector<6x16xf32>
    %148 = tpu.matmul %147, %146, %cst_74 {dimension_numbers = #tpu.dot_dimension_numbers<[1], [0], [0], [1], [0, 0, 1, 1], [], []>} : vector<6x8xf32>, vector<8x16xf32>, vector<6x16xf32> -> vector<6x16xf32>
    %c0_75 = arith.constant 0 : index
    %c0_76 = arith.constant 0 : index
    %149 = vector.load %arg15[%c0_75, %c0_76] : memref<6x1xf32, #tpu.memory_space<vmem>>, vector<6x1xf32>
    %150 = vector.broadcast %149 : vector<6x1xf32> to vector<6x16xf32>
    %151 = arith.addf %148, %150 : vector<6x16xf32>
    %152 = vector.extract_strided_slice %151 {offsets = [0, 0], sizes = [4, 16], strides = [1, 1]} : vector<6x16xf32> to vector<4x16xf32>
    %153 = vector.extract_strided_slice %151 {offsets = [4, 0], sizes = [1, 16], strides = [1, 1]} : vector<6x16xf32> to vector<1x16xf32>
    %154 = vector.extract_strided_slice %151 {offsets = [5, 0], sizes = [1, 16], strides = [1, 1]} : vector<6x16xf32> to vector<1x16xf32>
    %155 = vector.shape_cast %152 : vector<4x16xf32> to vector<1x4x16xf32>
    %156 = vector.shape_cast %15 : vector<1x16xf32> to vector<1x1x16xf32>
    %157 = vector.broadcast %156 : vector<1x1x16xf32> to vector<1x4x16xf32>
    %158 = arith.mulf %155, %157 : vector<1x4x16xf32>
    %159 = vector.shape_cast %158 : vector<1x4x16xf32> to vector<4x16xf32>
    %160 = vector.extract_strided_slice %22 {offsets = [16, 0], sizes = [1, 256], strides = [1, 1]} : vector<17x256xf32> to vector<1x256xf32>
    %cst_77 = arith.constant dense<0.000000e+00> : vector<1x256xf32>
    %161 = tpu.matmul %154, %20, %cst_77 {dimension_numbers = #tpu.dot_dimension_numbers<[1], [0], [0], [1], [0, 0, 1, 1], [], []>} : vector<1x16xf32>, vector<16x256xf32>, vector<1x256xf32> -> vector<1x256xf32>
    %162 = arith.addf %160, %161 : vector<1x256xf32>
    %cst_78 = arith.constant dense<0.000000e+00> : vector<1x256xf32>
    %163 = tpu.matmul %153, %19, %cst_78 {dimension_numbers = #tpu.dot_dimension_numbers<[1], [0], [0], [1], [0, 0, 1, 1], [], []>} : vector<1x16xf32>, vector<16x256xf32>, vector<1x256xf32> -> vector<1x256xf32>
    %164 = arith.addf %162, %163 : vector<1x256xf32>
    %cst_79 = arith.constant 0.000000e+00 : f32
    %165 = vector.broadcast %cst_79 : f32 to vector<1x256xf32>
    %166 = arith.cmpf ogt, %164, %165 : vector<1x256xf32>
    %cst_80 = arith.constant 0.000000e+00 : f32
    %167 = vector.broadcast %cst_80 : f32 to vector<1x256xf32>
    %168 = arith.minimumf %164, %167 : vector<1x256xf32>
    %169 = math.exp %168 : vector<1x256xf32>
    %cst_81 = arith.constant 1.000000e+00 : f32
    %170 = vector.broadcast %cst_81 : f32 to vector<1x256xf32>
    %171 = arith.subf %169, %170 : vector<1x256xf32>
    %172 = arith.select %166, %164, %171 : vector<1x256xi1>, vector<1x256xf32>
    %173 = arith.mulf %172, %13 : vector<1x256xf32>
    %174 = vector.broadcast %17 : vector<1x1xf32> to vector<1x256xf32>
    %175 = arith.mulf %173, %174 : vector<1x256xf32>
    %cst_82 = arith.constant dense<0.000000e+00> : vector<4x256xf32>
    %176 = tpu.matmul %159, %19, %cst_82 {dimension_numbers = #tpu.dot_dimension_numbers<[1], [0], [0], [1], [0, 0, 1, 1], [], []>} : vector<4x16xf32>, vector<16x256xf32>, vector<4x256xf32> -> vector<4x256xf32>
    %177 = vector.shape_cast %176 : vector<4x256xf32> to vector<1x4x256xf32>
    %178 = vector.shape_cast %175 : vector<1x256xf32> to vector<1x1x256xf32>
    %179 = vector.broadcast %178 : vector<1x1x256xf32> to vector<1x4x256xf32>
    %180 = arith.mulf %177, %179 : vector<1x4x256xf32>
    %181 = vector.shape_cast %180 : vector<1x4x256xf32> to vector<4x256xf32>
    %cst_83 = arith.constant dense<0.000000e+00> : vector<4x16xf32>
    %182 = tpu.matmul %181, %18, %cst_83 {dimension_numbers = #tpu.dot_dimension_numbers<[1], [0], [0], [1], [0, 0, 1, 1], [], []>} : vector<4x256xf32>, vector<256x16xf32>, vector<4x16xf32> -> vector<4x16xf32>
    %c0_84 = arith.constant 0 : index
    %c0_85 = arith.constant 0 : index
    %183 = vector.load %arg16[%c0_84, %c0_85] : memref<8x4xf32, #tpu.memory_space<vmem>>, vector<8x4xf32>
    %cst_86 = arith.constant dense<0.000000e+00> : vector<8x16xf32>
    %184 = tpu.matmul %183, %182, %cst_86 {dimension_numbers = #tpu.dot_dimension_numbers<[1], [0], [0], [1], [0, 0, 1, 1], [], []>} : vector<8x4xf32>, vector<4x16xf32>, vector<8x16xf32> -> vector<8x16xf32>
    %c0_87 = arith.constant 0 : index
    %c0_88 = arith.constant 0 : index
    %185 = vector.load %arg17[%c0_87, %c0_88] : memref<8x1xf32, #tpu.memory_space<vmem>>, vector<8x1xf32>
    %186 = vector.broadcast %185 : vector<8x1xf32> to vector<8x16xf32>
    %187 = arith.addf %184, %186 : vector<8x16xf32>
    %188 = arith.addf %187, %146 : vector<8x16xf32>
    %c0_89 = arith.constant 0 : index
    %c0_90 = arith.constant 0 : index
    %c0_91 = arith.constant 0 : index
    %189 = vector.load %arg21[%c0_89, %c0_90, %c0_91] : memref<1x8x16xf32, #tpu.memory_space<vmem>>, vector<1x8x16xf32>
    %190 = vector.shape_cast %189 : vector<1x8x16xf32> to vector<8x16xf32>
    %191 = vector.shape_cast %188 : vector<8x16xf32> to vector<1x8x16xf32>
    tpu.vector_store %arg21[%c0_89, %c0_90, %c0_91], %191 {strides = array<i32>} : memref<1x8x16xf32, #tpu.memory_space<vmem>>, vector<1x8x16xf32>,
    return
  }
  func.func @transform_0(%arg0: i32) -> (i32, i32, i32) {
    %c0_i32 = arith.constant 0 : i32
    %c0_i32_0 = arith.constant 0 : i32
    %c0_i32_1 = arith.constant 0 : i32
    return %arg0, %c0_i32, %c0_i32_0 : i32, i32, i32
  }
  func.func @transform_1(%arg0: i32) -> (i32, i32, i32) {
    %c0_i32 = arith.constant 0 : i32
    %c0_i32_0 = arith.constant 0 : i32
    %c0_i32_1 = arith.constant 0 : i32
    return %arg0, %c0_i32, %c0_i32_0 : i32, i32, i32
  }
  func.func @transform_2(%arg0: i32) -> (i32, i32, i32) {
    %c0_i32 = arith.constant 0 : i32
    %c0_i32_0 = arith.constant 0 : i32
    %c0_i32_1 = arith.constant 0 : i32
    return %arg0, %c0_i32, %c0_i32_0 : i32, i32, i32
  }
  func.func @transform_3(%arg0: i32) -> (i32, i32, i32) {
    %c0_i32 = arith.constant 0 : i32
    %c0_i32_0 = arith.constant 0 : i32
    %c0_i32_1 = arith.constant 0 : i32
    return %arg0, %c0_i32, %c0_i32_0 : i32, i32, i32
  }
  func.func @transform_4(%arg0: i32) -> (i32, i32, i32) {
    %c0_i32 = arith.constant 0 : i32
    %c0_i32_0 = arith.constant 0 : i32
    %c0_i32_1 = arith.constant 0 : i32
    return %arg0, %c0_i32, %c0_i32_0 : i32, i32, i32
  }
  func.func @transform_5(%arg0: i32) -> (i32, i32, i32) {
    %c0_i32 = arith.constant 0 : i32
    %c0_i32_0 = arith.constant 0 : i32
    %c0_i32_1 = arith.constant 0 : i32
    return %arg0, %c0_i32, %c0_i32_0 : i32, i32, i32
  }
  func.func @transform_6(%arg0: i32) -> (i32, i32, i32) {
    %c0_i32 = arith.constant 0 : i32
    %c0_i32_0 = arith.constant 0 : i32
    %c0_i32_1 = arith.constant 0 : i32
    return %arg0, %c0_i32, %c0_i32_0 : i32, i32, i32
  }
  func.func @transform_7(%arg0: i32) -> (i32, i32, i32) {
    %c0_i32 = arith.constant 0 : i32
    %c0_i32_0 = arith.constant 0 : i32
    %c0_i32_1 = arith.constant 0 : i32
    return %arg0, %c0_i32, %c0_i32_0 : i32, i32, i32
  }
  func.func @transform_8(%arg0: i32) -> (i32, i32, i32) {
    %c0_i32 = arith.constant 0 : i32
    %c0_i32_0 = arith.constant 0 : i32
    %c0_i32_1 = arith.constant 0 : i32
    return %arg0, %c0_i32, %c0_i32_0 : i32, i32, i32
  }
  func.func @transform_9(%arg0: i32) -> (i32, i32) {
    %c0_i32 = arith.constant 0 : i32
    %c0_i32_0 = arith.constant 0 : i32
    %c0_i32_1 = arith.constant 0 : i32
    return %c0_i32, %c0_i32_0 : i32, i32
  }
  func.func @transform_10(%arg0: i32) -> (i32, i32) {
    %c0_i32 = arith.constant 0 : i32
    %c0_i32_0 = arith.constant 0 : i32
    %c0_i32_1 = arith.constant 0 : i32
    return %c0_i32, %c0_i32_0 : i32, i32
  }
  func.func @transform_11(%arg0: i32) -> (i32, i32) {
    %c0_i32 = arith.constant 0 : i32
    %c0_i32_0 = arith.constant 0 : i32
    %c0_i32_1 = arith.constant 0 : i32
    return %c0_i32, %c0_i32_0 : i32, i32
  }
  func.func @transform_12(%arg0: i32) -> (i32, i32) {
    %c0_i32 = arith.constant 0 : i32
    %c0_i32_0 = arith.constant 0 : i32
    %c0_i32_1 = arith.constant 0 : i32
    return %c0_i32, %c0_i32_0 : i32, i32
  }
  func.func @transform_13(%arg0: i32) -> (i32, i32) {
    %c0_i32 = arith.constant 0 : i32
    %c0_i32_0 = arith.constant 0 : i32
    %c0_i32_1 = arith.constant 0 : i32
    return %c0_i32, %c0_i32_0 : i32, i32
  }
  func.func @transform_14(%arg0: i32) -> (i32, i32) {
    %c0_i32 = arith.constant 0 : i32
    %c0_i32_0 = arith.constant 0 : i32
    %c0_i32_1 = arith.constant 0 : i32
    return %c0_i32, %c0_i32_0 : i32, i32
  }
  func.func @transform_15(%arg0: i32) -> (i32, i32) {
    %c0_i32 = arith.constant 0 : i32
    %c0_i32_0 = arith.constant 0 : i32
    %c0_i32_1 = arith.constant 0 : i32
    return %c0_i32, %c0_i32_0 : i32, i32
  }
  func.func @transform_16(%arg0: i32) -> (i32, i32) {
    %c0_i32 = arith.constant 0 : i32
    %c0_i32_0 = arith.constant 0 : i32
    %c0_i32_1 = arith.constant 0 : i32
    return %c0_i32, %c0_i32_0 : i32, i32
  }
  func.func @transform_17(%arg0: i32) -> (i32, i32) {
    %c0_i32 = arith.constant 0 : i32
    %c0_i32_0 = arith.constant 0 : i32
    %c0_i32_1 = arith.constant 0 : i32
    return %c0_i32, %c0_i32_0 : i32, i32
  }
  func.func @transform_18(%arg0: i32) -> (i32, i32) {
    %c0_i32 = arith.constant 0 : i32
    %c0_i32_0 = arith.constant 0 : i32
    %c0_i32_1 = arith.constant 0 : i32
    return %c0_i32, %c0_i32_0 : i32, i32
  }
  func.func @transform_19(%arg0: i32) -> (i32, i32) {
    %c0_i32 = arith.constant 0 : i32
    %c0_i32_0 = arith.constant 0 : i32
    %c0_i32_1 = arith.constant 0 : i32
    return %c0_i32, %c0_i32_0 : i32, i32
  }
  func.func @transform_20(%arg0: i32) -> (i32, i32, i32) {
    %c0_i32 = arith.constant 0 : i32
    %c0_i32_0 = arith.constant 0 : i32
    %c0_i32_1 = arith.constant 0 : i32
    return %arg0, %c0_i32, %c0_i32_0 : i32, i32, i32
  }
}

</mosaic_0001>

<bundles_post_ra>
// kernel: tpu_custom_call.1
= control target key start
LH: loop header
LB: loop body
LE: loop exit
PB: predicated region body
PF: predicated region fallthrough
CT: control target
= control target key end

     0   :  { %s3596_s0 = inlined_call_operand.vmem [shape: f32[2,4,256], index: 0, kind: input, shape index: {}]   ;;  %s3597_s1 = inlined_call_operand.vmem [shape: f32[2,8,16], index: 1, kind: input, shape index: {}]   ;;  %s3598_s2 = inlined_call_operand.vmem [shape: f32[2,1,256], index: 2, kind: input, shape index: {}]   ;;  %s3599_s3 = inlined_call_operand.vmem [shape: f32[2,1,16], index: 3, kind: input, shape index: {}]   ;;  %s3600_s4 = inlined_call_operand.vmem [shape: f32[2,1,16], index: 4, kind: input, shape index: {}]   ;;  %s3601_s5 = inlined_call_operand.vmem [shape: f32[2,4,16], index: 5, kind: input, shape index: {}]   ;;  %s3602_s6 = inlined_call_operand.vmem [shape: f32[2,1,256], index: 6, kind: input, shape index: {}]   ;;  %s3603_s7 = inlined_call_operand.vmem [shape: f32[2,1,16], index: 7, kind: input, shape index: {}]   ;;  %s3604_s8 = inlined_call_operand.vmem [shape: f32[2,1,1], index: 8, kind: input, shape index: {}]   ;;  %s3605_s9 = inlined_call_operand.vmem [shape: f32[17,4], index: 9, kind: input, shape index: {}]   ;;  %s3606_s10 = inlined_call_operand.vmem [shape: f32[16,8], index: 10, kind: input, shape index: {}]   ;;  %s3607_s11 = inlined_call_operand.vmem [shape: f32[16,8], index: 11, kind: input, shape index: {}]   ;;  %s3608_s12 = inlined_call_operand.vmem [shape: f32[8,2], index: 12, kind: input, shape index: {}]   ;;  %s3609_s13 = inlined_call_operand.vmem [shape: f32[6,8], index: 13, kind: input, shape index: {}]   ;;  %s3610_s14 = inlined_call_operand.vmem [shape: f32[6,1], index: 14, kind: input, shape index: {}]   ;;  %s3611_s15 = inlined_call_operand.vmem [shape: f32[8,4], index: 15, kind: input, shape index: {}]   ;;  %s3612_s16 = inlined_call_operand.vmem [shape: f32[8,1], index: 16, kind: input, shape index: {}]   ;;  %s3613_s17 = inlined_call_operand.vmem [shape: f32[256,16], index: 17, kind: input, shape index: {}]   ;;  %s3614_s18 = inlined_call_operand.vmem [shape: f32[16,256], index: 18, kind: input, shape index: {}]   ;;  %s3615_s19 = inlined_call_operand.vmem [shape: f32[16,256], index: 19, kind: input, shape index: {}]   ;;  %s3616_s20 = inlined_call_operand.hbm [shape: f32[2,8,16], index: 20, kind: output, shape index: {}]  }
   0x1   :  { %3627 = sst [smem:[#allocation13_spill]] %s3596_s0 }
   0x2   :  { %3628 = sst [smem:[#allocation14_spill]] %s3597_s1 }
   0x3   :  { %3629 = sst [smem:[#allocation15_spill]] %s3598_s2 }
   0x4   :  { %3630 = sst [smem:[#allocation16_spill]] %s3599_s3 }
   0x5   :  { %3631 = sst [smem:[#allocation17_spill]] %s3600_s4 }
   0x6   :  { %3632 = sst [smem:[#allocation18_spill]] %s3611_s15 }
   0x7   :  { %3633 = sst [smem:[#allocation19_spill]] %s3616_s20 }
   0x8   :  { %25 = vsyncpa [#allocation3], 0 }
   0x9   :  { %27 = vsyncpa [#allocation3 + $0x1], 0  ;;  %s3048_s1 = smov 0   ;;  %s3050_s22 = smov 0  }
   0xa   :  { %s3052_s23 = smov 0   ;;  %s3054_s24 = smov 0  }
   0xb LB: > { %3634 = sst [smem:[#allocation5_spill]] %s2924_s1  ;;  %s3069_s2 = sadd.s32 4294967295, %s2936_s24   ;;  %s2936_s24 = sphi %s3054_s24, %s3658_s24   ;;  %s2932_s23 = sphi %s3052_s23, %s3660_s23   ;;  %s2928_s22 = sphi %s3050_s22, %s3662_s22   ;;  %s2924_s1 = sphi %s3048_s1, %s3661_s1  }
   0xc   : > { %3635 = sst [smem:[#allocation6_spill]] %s2932_s23  ;;  %s2356_s25 = sadd.s32 4294967294, %s2936_s24  }
   0xd   : > { %3636 = sst [smem:[#allocation7_spill]] %s2936_s24  ;;  %s3073_s3 = sadd.s32 1, %s2936_s24  }
   0xe   : > { %3637 = sst [smem:[#allocation8_spill]] %s3069_s2  ;;  %s505_s26 = sadd.s32 1, %s2932_s23 }
   0xf   : > { %3638 = sst [smem:[#allocation9_spill]] %s3073_s3  ;;  %s502_s27 = ssub.s32 %s2936_s24, %s3073_s3 }
  0x10   : > { %p515_p0 = scmp.ne.s32.totalorder %s2932_s23, %s2928_s22  ;;  %p503_p1 = scmp.eq.s32.totalorder %s502_s27, 0 }
  0x11   : > { %p516_p2 = scmp.eq.s32.totalorder %s3069_s2, 1  ;;  %p521_p3 = scmp.ne.s32.totalorder %s2928_s22, %s2924_s1 }
  0x12   : > { %p522_p4 = scmp.eq.s32.totalorder %s2356_s25, 1  ;;  %p2359_p7 = scmp.ge.s32.totalorder %s2936_s24, 1 }
  0x13   : > { %s3084_s28 = scalar_select %p503_p1, %s2932_s23, %s505_s26  }
  0x14   : > { %p3086_p5 = por %p516_p2, %p515_p0  ;;  %p3090_p6 = por %p522_p4, %p521_p3 }
  0x15   : > { %3639 = sst [smem:[#allocation10_spill]] %s3084_s28  ;;  %p633_p8 = scmp.lt.s32.totalorder %s2936_s24, 3 }
  0x16   : > { %s3640_s4 = scalar_select %p3086_p5, 1, 0 }
  0x17   : > { %s3642_s29 = scalar_select %p3090_p6, 1, 0 }
  0x18   : > { %3641 = sst [smem:[#allocation11_spill]] %s3640_s4  ;;  %p634_p9 = pnand %p2359_p7, %p633_p8 }
  0x19   : > { %3643 = sst [smem:[#allocation12_spill]] %s3642_s29  ;;  %p719_p10 = scmp.lt.s32.totalorder (!%p634_p9), %s3069_s2, 1  ;;  %v2938_v0 = vmov (!%p634_p9), 0.0   ;;  %vm2939_vm0 = vmmov (!%p634_p9), 0   ;;  %vm816_vm1 = vcmask (!%p634_p9), 1043456   ;;  %v801_v4 = vld [vmem:[%s3605_s9] sm:$0xff] (!%p634_p9)  ;;  %v1073_v10 = vlaneseq (!%p634_p9) }
  0x1a   : > { %637 = sbr.rel (%p634_p9) target bundleno = 2303 (0x8ff), region = 100  ;;  %885 = vmatprep.mubr.f32.mxu0 (!%p634_p9), %v2938_v0  ;;  %2588 = vmatprep.subr.mxu1 (!%p634_p9), %v2938_v0  ;;  %s3644_s27 = sld [smem:[#allocation13_spill]] (!%p634_p9)  ;;  %vm806_vm2 = vcmask (!%p634_p9), 31744   ;;  %v802_v6 = vld [vmem:[%s3605_s9 + $0x8] sm:$0xff] (!%p634_p9)  ;;  %v803_v7 = vld [vmem:[%s3605_s9 + $0x10] sm:$0x1] (!%p634_p9) }
  0x1b   : > { %2590 = vmatprep.mubr.msk.f32.mxu1 (!%p634_p9), %vm2939_vm0, %v2938_v0  ;;  %s3645_s29 = sld [smem:[#allocation14_spill]] (!%p634_p9)  ;;  %v986_v8 = vld [vmem:[%s3606_s10] sm:$0xff] (!%p634_p9)  ;;  %vm989_vm3 = vcmask (!%p634_p9), 64512   ;;  %v987_v9 = vld [vmem:[%s3606_s10 + $0x8] sm:$0xff] (!%p634_p9)  ;;  %v1074_v11 = vshrl.u32 (!%p634_p9), %v1073_v10, 7  ;;  %v2940_v12 = vmov (!%p634_p9), 0  }
  0x1c   : > { %2846 = vset.pattern.permute.xlu0 (!%p634_p9), %v2940_v12  ;;  %v794_v16 = vld [vmem:[%s3614_s18 + $0x8] sm:$0xff] (!%p634_p9)  ;;  %v796_v17 = vld [vmem:[%s3614_s18 + $0x18] sm:$0xff] (!%p634_p9)  ;;  %v793_v19 = vld [vmem:[%s3614_s18] sm:$0xff] (!%p634_p9)  ;;  %s3646_s20 = sld [smem:[#allocation15_spill]] (!%p634_p9)  ;;  %s3647_s24 = sld [smem:[#allocation16_spill]] (!%p634_p9)  ;;  %vm1174_vm7 = vcmask (!%p634_p9), 130048  }
  0x1d   : > { %v1079_v14 = vsub.s32 (!%p634_p9), 1, %v1074_v11  ;;  %v3170_v18 = vpack.c.bf16 (!%p634_p9), %v796_v17, %v794_v16  ;;  %v795_v20 = vld [vmem:[%s3614_s18 + $0x10] sm:$0xff] (!%p634_p9)  ;;  %v777_v22 = vld [vmem:[%s3613_s17 + $0x80] sm:$0xff] (!%p634_p9)  ;;  %v778_v23 = vld [vmem:[%s3613_s17 + $0x88] sm:$0xff] (!%p634_p9)  ;;  %v3269_v50 = vsub.s32 (!%p634_p9), 0, %v1074_v11  ;;  %s3652_s3 = sld [smem:[#allocation18_spill]] (!%p634_p9) }
  0x1e   : > { %v3178_v21 = vpack.c.bf16 (!%p634_p9), %v795_v20, %v793_v19  ;;  %v761_v24 = vld [vmem:[%s3613_s17] sm:$0xff] (!%p634_p9)  ;;  %v3191_v25 = vpack.c.bf16 (!%p634_p9), %v778_v23, %v777_v22  ;;  %v762_v26 = vld [vmem:[%s3613_s17 + $0x8] sm:$0xff] (!%p634_p9)  ;;  %v779_v27 = vld [vmem:[%s3613_s17 + $0x90] sm:$0xff] (!%p634_p9) }
  0x1f   : > { %v780_v28 = vld [vmem:[%s3613_s17 + $0x98] sm:$0xff] (!%p634_p9)  ;;  %v3202_v29 = vpack.c.bf16 (!%p634_p9), %v762_v26, %v761_v24  ;;  %v763_v31 = vld [vmem:[%s3613_s17 + $0x10] sm:$0xff] (!%p634_p9)  ;;  %v781_v33 = vld [vmem:[%s3613_s17 + $0xa0] sm:$0xff] (!%p634_p9) }
  0x20   : > { %v3204_v30 = vpack.c.bf16 (!%p634_p9), %v780_v28, %v779_v27  ;;  %v764_v32 = vld [vmem:[%s3613_s17 + $0x18] sm:$0xff] (!%p634_p9)  ;;  %v782_v34 = vld [vmem:[%s3613_s17 + $0xa8] sm:$0xff] (!%p634_p9)  ;;  %v765_v37 = vld [vmem:[%s3613_s17 + $0x20] sm:$0xff] (!%p634_p9) }
  0x21   : > { %s3100_s30 = scalar_select %p719_p10, %s3069_s2, 1  ;;  %v3221_v35 = vpack.c.bf16 %v764_v32, %v763_v31  ;;  %v3224_v36 = vpack.c.bf16 %v782_v34, %v781_v33  ;;  %v766_v38 = vld [vmem:[%s3613_s17 + $0x28] sm:$0xff]  ;;  %v783_v39 = vld [vmem:[%s3613_s17 + $0xb0] sm:$0xff]  ;;  %v784_v40 = vld [vmem:[%s3613_s17 + $0xb8] sm:$0xff] }
  0x22   : > { %v3239_v41 = vpack.c.bf16 %v766_v38, %v765_v37  ;;  %v3242_v42 = vpack.c.bf16 %v784_v40, %v783_v39  ;;  %v767_v43 = vld [vmem:[%s3613_s17 + $0x30] sm:$0xff]  ;;  %v768_v44 = vld [vmem:[%s3613_s17 + $0x38] sm:$0xff]  ;;  %v785_v45 = vld [vmem:[%s3613_s17 + $0xc0] sm:$0xff] }
  0x23   : > { %s2398_s0 = sshll.u32 %s3100_s30, 3  ;;  %s2365_s21 = sshll.u32 %s3100_s30, 2  ;;  %v786_v46 = vld [vmem:[%s3613_s17 + $0xc8] sm:$0xff]  ;;  %v3257_v47 = vpack.c.bf16 %v768_v44, %v767_v43  ;;  %v787_v16 = vld [vmem:[%s3613_s17 + $0xd0] sm:$0xff]  ;;  %v788_v17 = vld [vmem:[%s3613_s17 + $0xd8] sm:$0xff] }
  0x24   : > { %s723_s28 = scalar_lea.vmem %s3644_s27, %s2398_s0  ;;  %s727_s1 = scalar_lea.vmem %s3645_s29, %s2398_s0  ;;  %v3260_v48 = vpack.c.bf16 %v786_v46, %v785_v45  ;;  %v770_v10 = vld [vmem:[%s3613_s17 + $0x48] sm:$0xff]  ;;  %v3320_v19 = vpack.c.bf16 %v788_v17, %v787_v16  ;;  %v771_v20 = vld [vmem:[%s3613_s17 + $0x50] sm:$0xff]  ;;  %v772_v22 = vld [vmem:[%s3613_s17 + $0x58] sm:$0xff] }
  0x25   : > { %v752_v1 = vld [vmem:[%s723_s28] sm:$0xff]  ;;  %s741_s4 = scalar_lea.vmem %s3601_s5, %s2365_s21  ;;  %s734_s2 = scalar_lea.vmem %s3647_s24, %s3100_s30  ;;  %v3335_v26 = vpack.c.bf16 %v772_v22, %v771_v20  ;;  %v790_v32 = vld [vmem:[%s3613_s17 + $0xe8] sm:$0xff]  ;;  %v791_v43 = vld [vmem:[%s3613_s17 + $0xf0] sm:$0xff] }
  0x26   : > { %v805_v2 = vcombine.high %v752_v1, %v752_v1  ;;  %v757_v3 = vld [vmem:[%s741_s4] sm:$0xf]  ;;  %s2364_s4 = sshll.u32 %s3100_s30, 1  ;;  %v774_v38 = vld [vmem:[%s3613_s17 + $0x68] sm:$0xff]  ;;  %v792_v44 = vld [vmem:[%s3613_s17 + $0xf8] sm:$0xff]  ;;  %s751_s23 = scalar_lea.vmem %s3604_s8, %s3100_s30 }
  0x27   : > { %v3118_v5 = vld [vmem:[%s727_s1] sm:$0xff]  ;;  %2589 = vmatpush3.msk.msra.mxu1 %vm816_vm1, %v757_v3  ;;  %s745_s21 = scalar_lea.vmem %s3602_s6, %s2364_s4  ;;  %s731_s1 = scalar_lea.vmem %s3646_s20, %s2364_s4  ;;  %v775_v45 = vld [vmem:[%s3613_s17 + $0x70] sm:$0xff]  ;;  %v3372_v46 = vpack.c.bf16 %v792_v44, %v791_v43 }
  0x28   : > { %2367 = vmatprep.subr.msk.mxu0 %vm816_vm1, %v805_v2  ;;  %2591 = vmatmul.mubr.msk.f32.vlgmr.msra.gmra.mrb[0].mxu1 %vm806_vm2, %v801_v4  ;;  %v3159_v13 = vld [vmem:[%s745_s21] sm:$0x3]  ;;  %s3650_s21 = sld [smem:[#allocation17_spill]]  ;;  %s716_s28 = sand.u32 1, %s2928_s22  }
  0x29   : > { %2368 = vmatpush1.msk.msra.mxu0 %vm816_vm1, %v752_v1  ;;  %2593 = vmatprep.mubr.msk.f32.mxu1 %vm2939_vm0, %v2938_v0  ;;  %v3162_v15 = vrot.slane %v3159_v13, %v1079_v14  ;;  %v754_v49 = vld [vmem:[%s731_s1] sm:$0x3]  ;;  %s2360_s0 = sshll.u32 %s716_s28, 3  ;;  %s3654_s20 = sld [smem:[#allocation19_spill]] }
  0x2a   : > { %2369 = vmatmul.mubr.msk.f32.vlgmr.msra.gmra.mrb[0].mxu0 %vm806_vm2, %v801_v4  ;;  %2599 = vmatprep.subr.mxu0 %v3118_v5  ;;  %vm1071_vm4 = vcmp.gt.f32.partialorder %v754_v49, 0.0  ;;  %v755_v3 = vld [vmem:[%s734_s2] sm:$0x1]  ;;  %v776_v49 = vld [vmem:[%s3613_s17 + $0x78] sm:$0xff]  ;;  %s2200_s4 = scalar_lea.sflag [#allocation3], %s716_s28 }
  0x2b   : > { %891 = vmatprep.mubr.f32.mxu0 %v2938_v0  ;;  %2600 = vmatpush3.msra.mxu0 %v3118_v5  ;;  %v1072_v51 = vsel %vm1071_vm4, 1, %v2940_v12  ;;  %vm1322_vm8 = vcmp.gt.f32.partialorder %v755_v3, 0.0  ;;  %v789_v31 = vld [vmem:[%s3613_s17 + $0xe0] sm:$0xff] }
  0x2c   : > { %2594 = vmatmul.mubr.msk.f32.gmra.mrb[2].mxu1 %vm806_vm2, %v802_v6  ;;  %2652 = vmatprep.subr.bf16.mxu0 %v3170_v18  ;;  %v1076_v52 = vrot.slane %v1072_v51, %v3269_v50  ;;  %v1080_v53 = vrot.slane %v1072_v51, %v1079_v14  ;;  %v3349_v34 = vpack.c.bf16 %v790_v32, %v789_v31  ;;  %v773_v37 = vld [vmem:[%s3613_s17 + $0x60] sm:$0xff] }
  0x2d   : > { %2596 = vmatprep.mubr.msk.f32.mxu1 %vm2939_vm0, %v2938_v0  ;;  %2620 = vmatprep.subr.bf16.mxu1 %v3191_v25  ;;  %v3358_v40 = vpack.c.bf16 %v774_v38, %v773_v37  ;;  %v3378_v51 = vpack.c.bf16 %v776_v49, %v775_v45  ;;  %v1349_v17 = vld [vmem:[%s3607_s11] sm:$0xff] }
  0x2e   : > { %2370 = vmatmul.mubr.msk.f32.gmra.mrb[2].mxu0 %vm806_vm2, %v802_v6  ;;  %2622 = vmatpush3.bf16.msra.mxu1 %v3202_v29  ;;  %vm1081_vm5 = vcmp.eq.s32.totalorder %v1076_v52, 1  ;;  %vm1082_vm6 = vcmp.eq.s32.totalorder %v1080_v53, 1  ;;  %v3392_v52 = vld [vmem:[%s3608_s12] sm:$0xff]  ;;  %s737_s25 = scalar_lea.vmem %s3650_s21, %s3100_s30 }
  0x2f   : > { %897 = vmatprep.mubr.f32.mxu0 %v2938_v0  ;;  %2624 = vmatprep.subr.bf16.mxu1 %v3204_v30  ;;  %v2378_v37 = vld [vmem:[%s737_s25] ss:$0 sm:$0xff]  ;;  %s718_s25 = scalar_lea.vmem [#allocation2], %s2360_s0 }
  0x30   : > { %2597 = vmatmul.mubr.msk.f32.gmra.mrb[4].mxu1 %vm806_vm2, %v803_v7  ;;  %s2213_s26 = sshll.u32 %s718_s25, 4  ;;  %s3555_s26 = int_to_ptr.vmem [resolvable:$true] %s2213_s26 }
  0x32   : > { %2371 = vmatmul.mubr.msk.f32.gmra.mrb[4].mxu0 %vm806_vm2, %v803_v7  ;;  %2626 = vmatpush3.bf16.msra.mxu1 %v3221_v35 }
  0x33   : > { %2601 = vmatprep.mubr.msk.f32.mxu0 %vm989_vm3, %v986_v8  ;;  %2628 = vmatprep.subr.bf16.mxu1 %v3224_v36  ;;  %v1323_v8 = vsel %vm1322_vm8, 1, %v2940_v12 }
  0x34   : > { %v1327_v11 = vrot.slane %v1323_v8, %v3269_v50 }
  0x36   : > { %2602 = vmatmul.mubr.msk.f32.vlgmr.msra.gmra.mrb[6].mxu0 %vm989_vm3, %v987_v9  ;;  %2630 = vmatpush3.bf16.msra.mxu1 %v3239_v41  ;;  %v769_v9 = vld [vmem:[%s3613_s17 + $0x40] sm:$0xff]  ;;  %vm3329_vm9 = vcmp.eq.s32.totalorder %v1327_v11, 1 }
  0x37   : > { %1242 = vmatprep.mubr.f32.mxu0 %v2938_v0  ;;  %2654 = vmatpush1.bf16.msra.mxu0 %v3178_v21  ;;  %v3310_v14 = vpack.c.bf16 %v770_v10, %v769_v9 }
  0x38   : > { %2656 = vmatprep.subr.bf16.mxu0 %v3191_v25  ;;  %2632 = vmatprep.subr.bf16.mxu1 %v3242_v42 }
  0x3a   : > { %2634 = vmatpush3.bf16.msra.mxu1 %v3257_v47 }
  0x3b   : > { %2636 = vmatprep.subr.bf16.mxu1 %v3260_v48 }
  0x3e   : > { %2638 = vmatpush3.bf16.msra.mxu1 %v3310_v14 }
  0x3f   : > { %2640 = vmatprep.subr.bf16.mxu1 %v3320_v19 }
  0x42   : > { %2642 = vmatpush3.bf16.msra.mxu1 %v3335_v26 }
  0x43   : > { %2644 = vmatprep.subr.bf16.mxu1 %v3349_v34 }
  0x46   : > { %2646 = vmatpush3.bf16.msra.mxu1 %v3358_v40 }
  0x47   : > { %2648 = vmatprep.subr.bf16.mxu1 %v3372_v46 }
  0x4a   : > { %2650 = vmatpush3.bf16.msra.mxu1 %v3378_v51 }
  0x4b   : > { %2688 = vmatprep.subr.bf16.mxu1 %v3191_v25 }
  0xfb   : > { %v3273_v54 = vpop.f32.mrb[0].mxu1 }
  0xfc   : > { %v2592_v55 = vpop.f32.mrb[1].mxu1  ;;  %v1329_v20 = vsel %vm3329_vm9, %v3273_v54, -1e+30 }
  0xfd   : > { %v887_v56 = vpop.f32.mrb[0].mxu0 }
  0xfe   : > { %v3275_v57 = vsel %vm1081_vm5, %v887_v56, -1e+30  ;;  %v889_v58 = vpop.f32.mrb[1].mxu0 }
  0xff   : > { %v3277_v59 = vsel %vm1082_vm6, %v889_v58, -1e+30  ;;  %v3333_v24 = vpop.f32.mrb[2].mxu1 }
 0x100   : > { %v1085_v60 = vmax.f32 %v3275_v57, %v3277_v59  ;;  %v1664_v27 = vsel %vm3329_vm9, %v3333_v24, -1e+30  ;;  %v2595_v28 = vpop.f32.mrb[3].mxu1 }
 0x101   : > { %v893_v61 = vpop.f32.mrb[2].mxu0 }
 0x102   : > { %v3281_v62 = vsel %vm1081_vm5, %v893_v61, -1e+30  ;;  %1086 = vmax.xlane.f32.xlu0 %v1085_v60  ;;  %v895_v63 = vpop.f32.mrb[3].mxu0 }
 0x103   : > { %v3283_v1 = vsel %vm1082_vm6, %v895_v63, -1e+30  ;;  %v983_v33 = vpop.f32.mrb[4].mxu1 }
 0x104   : > { %v1434_v2 = vmax.f32 %v3281_v62, %v3283_v1  ;;  %v2598_v39 = vpop.f32.mrb[5].mxu1 }
 0x106   : > { %1435 = vmax.xlane.f32.xlu1 %v1434_v2 }
 0x109   : > { %v3291_v4 = vpop.f32.mrb[6].mxu0 }
 0x10a   : > { %v3293_v6 = vpop.f32.mrb[7].mxu0  ;;  %2379 = vmatmul.mubr.msk.f32.vlgmr.msra.gmra.mrb[8].mxu0 %vm1174_vm7, %v3291_v4 }
 0x10b   : > { %v1334_v7 = vsub.f32 %v3293_v6, %v3291_v4  ;;  %2658 = vmatpush3.bf16.msra.mxu0 %v3202_v29 }
 0x10c   : > { %2660 = vmatprep.subr.bf16.mxu0 %v3204_v30 }
 0x10f   : > { %2662 = vmatpush3.bf16.msra.mxu0 %v3221_v35 }
 0x110   : > { %2664 = vmatprep.subr.bf16.mxu0 %v3224_v36 }
 0x113   : > { %2666 = vmatpush3.bf16.msra.mxu0 %v3239_v41 }
 0x114   : > { %2668 = vmatprep.subr.bf16.mxu0 %v3242_v42 }
 0x117   : > { %2670 = vmatpush3.bf16.msra.mxu0 %v3257_v47 }
 0x118   : > { %2672 = vmatprep.subr.bf16.mxu0 %v3260_v48  ;;  %1339 = vperm.xlu0 %2846, %v3392_v52  }
 0x11b   : > { %2674 = vmatpush3.bf16.msra.mxu0 %v3310_v14 }
 0x11c   : > { %2676 = vmatprep.subr.bf16.mxu0 %v3320_v19 }
 0x11f   : > { %2678 = vmatpush3.bf16.msra.mxu0 %v3335_v26 }
 0x120   : > { %2680 = vmatprep.subr.bf16.mxu0 %v3349_v34 }
 0x123   : > { %2682 = vmatpush3.bf16.msra.mxu0 %v3358_v40 }
 0x124   : > { %2684 = vmatprep.subr.bf16.mxu0 %v3372_v46 }
 0x127   : > { %2686 = vmatpush3.bf16.msra.mxu0 %v3378_v51 }
 0x18f   : > { %v1087_v53 = vpop.xlane.xlu0 %1086 }
 0x190   : > { %v1088_v55 = vsub.f32 %v3275_v57, %v1087_v53  ;;  %v1089_v56 = vsub.f32 %v3277_v59, %v1087_v53  ;;  %v1330_v22 = vsub.f32 %v1329_v20, %v1087_v53 }
 0x192   : > { %v1090_v58 = vmul.f32 1.442695, %v1088_v55  ;;  %v1092_v60 = vmul.f32 1.442695, %v1089_v56  ;;  %v1331_v33 = vmul.f32 1.442695, %v1330_v22 }
 0x193   : > { %v1436_v61 = vpop.xlane.xlu1 %1435 }
 0x194   : > { %2850 = vpow2.f32 %v1090_v58  ;;  %v1438_v63 = vsub.f32 %v3283_v1, %v1436_v61  ;;  %v1437_v57 = vsub.f32 %v3281_v62, %v1436_v61  ;;  %v1665_v49 = vsub.f32 %v1664_v27, %v1436_v61 }
 0x195   : > { %2852 = vpow2.f32 %v1092_v60 }
 0x196   : > { %v1441_v2 = vmul.f32 1.442695, %v1438_v63  ;;  %v1439_v59 = vmul.f32 1.442695, %v1437_v57  ;;  %v1666_v58 = vmul.f32 1.442695, %v1665_v49 }
 0x197   : > { %v1340_v24 = vpop.permute.xlu0 %1339 }
 0x198   : > { %2854 = vpow2.f32 %v1441_v2 }
 0x199   : > { %2856 = vpow2.f32 %v1439_v59 }
 0x19e   : > { %v2851_v3 = vpop.eup %2850 }
 0x19f   : > { %v2853_v8 = vpop.eup %2852 }
 0x1a0   : > { %1158 = vmatprep.mubr.f32.mxu1 %v2853_v8 }
 0x1a1   : > { %1159 = vmatmul.mubr.f32.vlgmr.msra.gmra.mrb[6].mxu1 %v2851_v3 }
 0x1a2   : > { %2690 = vmatpush3.bf16.msra.mxu1 %v3202_v29  ;;  %v3399_v9 = vpop.eup %2854 }
 0x1a3   : > { %2692 = vmatprep.subr.bf16.mxu1 %v3204_v30  ;;  %1507 = vmatprep.mubr.f32.mxu1 %v3399_v9  ;;  %v3418_v62 = vpop.eup %2856 }
 0x1a6   : > { %2694 = vmatpush3.bf16.msra.mxu1 %v3221_v35 }
 0x1a7   : > { %2696 = vmatprep.subr.bf16.mxu1 %v3224_v36 }
 0x1aa   : > { %2698 = vmatpush3.bf16.msra.mxu1 %v3239_v41 }
 0x1ab   : > { %2700 = vmatprep.subr.bf16.mxu1 %v3242_v42 }
 0x1ae   : > { %2702 = vmatpush3.bf16.msra.mxu1 %v3257_v47 }
 0x1af   : > { %2704 = vmatprep.subr.bf16.mxu1 %v3260_v48 }
 0x1b2   : > { %2706 = vmatpush3.bf16.msra.mxu1 %v3310_v14 }
 0x1b3   : > { %2708 = vmatprep.subr.bf16.mxu1 %v3320_v19 }
 0x1b6   : > { %2710 = vmatpush3.bf16.msra.mxu1 %v3335_v26 }
 0x1b7   : > { %2712 = vmatprep.subr.bf16.mxu1 %v3349_v34 }
 0x1ba   : > { %2714 = vmatpush3.bf16.msra.mxu1 %v3358_v40 }
 0x1bb   : > { %2716 = vmatprep.subr.bf16.mxu1 %v3372_v46 }
 0x1be   : > { %2718 = vmatpush3.bf16.msra.mxu1 %v3378_v51 }
 0x1bf   : > { %2609 = vmatprep.subr.mxu1 %v2938_v0 }
 0x1c1   : > { %1508 = vmatmul.mubr.f32.vlgmr.msra.gmra.mrb[8].mxu1 %v3418_v62 }
 0x1c2   : > { %2611 = vmatprep.mubr.msk.f32.mxu1 %vm2939_vm0, %v2938_v0 }
 0x1dd   : > { %v1244_v1 = vpop.f32.mrb[8].mxu0 }
 0x1de   : > { %v1249_v10 = vmul.f32 %v2851_v3, %v1244_v1  ;;  %v1246_v11 = vpop.f32.mrb[9].mxu0 }
 0x1df   : > { %v1250_v16 = vmul.f32 %v2853_v8, %v1246_v11 }
 0x1e1   : > { %1315 = vmatprep.mubr.f32.mxu0 %v1250_v16  ;;  %v1350_v16 = vld [vmem:[%s3607_s11 + $0x8] sm:$0xff] }
 0x1e2   : > { %1316 = vmatmul.mubr.f32.vlgmr.msra.gmra.mrb[10].mxu0 %v1249_v10 }
 0x1e3   : > { %2606 = vmatprep.mubr.msk.f32.mxu0 %vm989_vm3, %v1349_v17 }
 0x274   : > { %v2438_v28 = vpop.f32.mrb[6].mxu1 }
 0x275   : > { %v2439_v31 = vpop.f32.mrb[7].mxu1 }
 0x276   : > { %v2440_v32 = vadd.f32 %v2439_v31, %v2438_v28  ;;  %v2941_v31 = vmov 1  }
 0x277   : > { %2847 = vset.pattern.permute.xlu1 %v2941_v31 }
 0x278   : > { %2858 = vrcp.f32 %v2440_v32  ;;  %vm1164_vm10 = vcmp.gt.f32.partialorder %v2440_v32, 0.0  ;;  %1673 = vperm.xlu1 %2847, %v3392_v52   ;;  %v2115_v52 = vld [vmem:[%s3612_s16] sm:$0xff] }
 0x279   : > { %2860 = vpow2.f32 %v1331_v33 }
 0x27c   : > { %2848 = vset.pattern.permute.xlu1 %v2940_v12  ;;  %v760_v12 = vld [vmem:[%s751_s23] sm:$0x1]  ;;  %s748_s23 = scalar_lea.vmem %s3603_s7, %s3100_s30  ;;  %s3651_s30 = sld [smem:[#allocation8_spill]] }
 0x282   : > { %v2859_v38 = vpop.eup %2858  ;;  %s2395_s21 = sshll.u32 %s3651_s30, 7  ;;  %s2942_s30 = smov [#allocation2]  }
 0x283   : > { %v1172_v39 = vmul.f32 %v2859_v38, %v2378_v37  ;;  %v2861_v43 = vpop.eup %2860  ;;  %s3553_s1 = scalar_lea.hbm %s3654_s20, %s2395_s21  ;;  %s2878_s24 = sshll.u32 %s2942_s30, 4  ;;  %s2879_s24 = int_to_ptr.vmem [resolvable:$false] %s2878_s24 }
 0x284   : > { %s2880_s2 = scalar_lea.vmem %s2879_s24, 256  ;;  %p2881_p0 = scmp.lt.s32.totalorder %s3555_s26, %s2879_s24 }
 0x285   : > { %v1173_v44 = vsel %vm1164_vm10, %v1172_v39, 0.0  ;;  %v1685_v39 = vld [vmem:[%s3610_s14] sm:$0x3f] }
 0x286   : > { %v1333_v45 = vmul.f32 %v2861_v43, %v1173_v44  ;;  %1688 = vperm.xlu1 %2848, %v1685_v39  }
 0x288   : > { %v1335_v54 = vmul.f32 %v1334_v7, %v1333_v45 }
 0x28a   : > { %1951 = vperm.xlu1 %2848, %v760_v12  }
 0x28e   : > { %2118 = vperm.xlu1 %2848, %v2115_v52  }
 0x294   : > { %v2511_v53 = vpop.f32.mrb[8].mxu1 }
 0x295   : > { %v2512_v55 = vpop.f32.mrb[9].mxu1 }
 0x296   : > { %v2513_v56 = vadd.f32 %v2512_v55, %v2511_v53 }
 0x298   : > { %2862 = vrcp.f32 %v2513_v56  ;;  %vm1513_vm11 = vcmp.gt.f32.partialorder %v2513_v56, 0.0 }
 0x299   : > { %2864 = vpow2.f32 %v1666_v58 }
 0x2a2   : > { %v2863_v60 = vpop.eup %2862 }
 0x2a3   : > { %v1515_v63 = vmul.f32 %v2863_v60, %v2378_v37  ;;  %v2865_v2 = vpop.eup %2864 }
 0x2a5   : > { %v3441_v3 = vsel %vm1513_vm11, %v1515_v63, 0.0 }
 0x2a6   : > { %v1668_v4 = vmul.f32 %v2865_v2, %v3441_v3  ;;  %v1684_v2 = vld [vmem:[%s3609_s13] sm:$0x3f] }
 0x2b5   : > { %v2473_v6 = vpop.f32.mrb[10].mxu0 }
 0x2b6   : > { %v2474_v7 = vpop.f32.mrb[11].mxu0 }
 0x2b7   : > { %v2475_v23 = vadd.f32 %v2474_v7, %v2473_v6  ;;  %v797_v6 = vld [vmem:[%s3615_s19] sm:$0xff]  ;;  %v799_v7 = vld [vmem:[%s3615_s19 + $0x10] sm:$0xff] }
 0x2b9   : > { %v1321_v8 = vmul.f32 %v2475_v23, %v1173_v44  ;;  %v2757_v23 = vpack.c.bf16 %v799_v7, %v797_v6 }
 0x2bb   : > { %v1336_v27 = vadd.f32 %v1335_v54, %v1321_v8  ;;  %v2386_v8 = vld [vmem:[%s748_s23] ss:$0 sm:$0xff]  ;;  %s2874_s23 = scalar_lea.vmem %s3555_s26, 128 }
 0x2bc   : > { %p2875_p11 = scmp.ne.s32.totalorder %s3555_s26, %s2874_s23  ;;  %p2882_p1 = scmp.lt.s32.totalorder %s2880_s2, %s2874_s23 }
 0x2bd   : > { %v1342_v61 = vadd.f32 %v1340_v24, %v1336_v27 }
 0x2be   : > { %p2876_p12 = pnand %p2875_p11, %p3086_p5  ;;  %p2883_p2 = por %p2882_p1, %p2881_p0 }
 0x2bf   : > { %v1344_v57 = vmin.f32 %v1342_v61, 0.0  ;;  %vm1343_vm12 = vcmp.gt.f32.partialorder %v1342_v61, 0.0 }
 0x2c0   : > { %p2877_p13 = pneg %p2876_p12 }
 0x2c1   : > { %v1345_v59 = vmul.f32 1.442695, %v1344_v57 }
 0x2c2   : > { %p2884_p3 = pnand %p2883_p2, %p2877_p13 }
 0x2c3   : > { %2866 = vpow2.f32 %v1345_v59 }
 0x2cd   : > { %v2867_v1 = vpop.eup %2866 }
 0x2ce   : > { %v2380_v10 = vadd.f32 -1.0, %v2867_v1 }
 0x2d0   : > { %v1348_v11 = vsel %vm1343_vm12, %v1342_v61, %v2380_v10 }
 0x2d1   : > { %2604 = vmatprep.subr.mxu0 %v1348_v11 }
 0x2d2   : > { %2605 = vmatpush3.msra.mxu0 %v1348_v11 }
 0x2d3   : > { %2607 = vmatmul.mubr.msk.f32.vlgmr.msra.gmra.mrb[12].mxu0 %vm989_vm3, %v1350_v16  ;;  %2720 = vmatprep.subr.bf16.mxu0 %v3170_v18 }
 0x2d4   : > { %2722 = vmatpush1.bf16.msra.mxu0 %v3178_v21  ;;  %1584 = vmatprep.mubr.f32.mxu0 %v2938_v0 }
 0x2d5   : > { %2724 = vmatprep.subr.bf16.mxu0 %v3191_v25 }
 0x2f7   : > { %v1674_v45 = vpop.permute.xlu1 %1673 }
 0x3a6   : > { %v2608_v17 = vpop.f32.mrb[12].mxu0 }
 0x3a7   : > { %v1423_v20 = vpop.f32.mrb[13].mxu0  ;;  %2383 = vmatmul.mubr.msk.f32.vlgmr.msra.gmra.mrb[14].mxu0 %vm1174_vm7, %v2608_v17 }
 0x3a8   : > { %v1669_v22 = vsub.f32 %v1423_v20, %v2608_v17  ;;  %2726 = vmatpush3.bf16.msra.mxu0 %v3202_v29 }
 0x3a9   : > { %2728 = vmatprep.subr.bf16.mxu0 %v3204_v30 }
 0x3aa   : > { %v1670_v28 = vmul.f32 %v1669_v22, %v1668_v4 }
 0x3ac   : > { %2730 = vmatpush3.bf16.msra.mxu0 %v3221_v35 }
 0x3ad   : > { %2732 = vmatprep.subr.bf16.mxu0 %v3224_v36 }
 0x3b0   : > { %2734 = vmatpush3.bf16.msra.mxu0 %v3239_v41 }
 0x3b1   : > { %2736 = vmatprep.subr.bf16.mxu0 %v3242_v42 }
 0x3b4   : > { %2738 = vmatpush3.bf16.msra.mxu0 %v3257_v47 }
 0x3b5   : > { %2740 = vmatprep.subr.bf16.mxu0 %v3260_v48 }
 0x3b8   : > { %2742 = vmatpush3.bf16.msra.mxu0 %v3310_v14 }
 0x3b9   : > { %2744 = vmatprep.subr.bf16.mxu0 %v3320_v19 }
 0x3bc   : > { %2746 = vmatpush3.bf16.msra.mxu0 %v3335_v26 }
 0x3bd   : > { %2748 = vmatprep.subr.bf16.mxu0 %v3349_v34 }
 0x3c0   : > { %2750 = vmatpush3.bf16.msra.mxu0 %v3358_v40 }
 0x3c1   : > { %2752 = vmatprep.subr.bf16.mxu0 %v3372_v46 }
 0x3c4   : > { %2754 = vmatpush3.bf16.msra.mxu0 %v3378_v51 }
 0x47a   : > { %v1586_v32 = vpop.f32.mrb[14].mxu0 }
 0x47b   : > { %v1588_v33 = vpop.f32.mrb[15].mxu0  ;;  %v1591_v38 = vmul.f32 %v3418_v62, %v1586_v32 }
 0x47c   : > { %v1592_v37 = vmul.f32 %v3399_v9, %v1588_v33  ;;  %v2114_v33 = vld [vmem:[%s3652_s3] sm:$0xff] }
 0x47e   : > { %1657 = vmatprep.mubr.f32.mxu0 %v1592_v37 }
 0x47f   : > { %1658 = vmatmul.mubr.f32.vlgmr.msra.gmra.mrb[16].mxu0 %v1591_v38 }
 0x480   : > { %1839 = vmatprep.mubr.f32.mxu0 %v2938_v0 }
 0x552   : > { %v2546_v9 = vpop.f32.mrb[16].mxu0 }
 0x553   : > { %v2547_v62 = vpop.f32.mrb[17].mxu0 }
 0x554   : > { %v2548_v43 = vadd.f32 %v2547_v62, %v2546_v9 }
 0x556   : > { %v1663_v44 = vmul.f32 %v2548_v43, %v3441_v3  ;;  %v800_v3 = vld [vmem:[%s3615_s19 + $0x18] sm:$0xff] }
 0x558   : > { %v1671_v54 = vadd.f32 %v1670_v28, %v1663_v44 }
 0x55a   : > { %v1676_v49 = vadd.f32 %v1674_v45, %v1671_v54 }
 0x55c   : > { %v1678_v53 = vmin.f32 %v1676_v49, 0.0  ;;  %vm1677_vm13 = vcmp.gt.f32.partialorder %v1676_v49, 0.0 }
 0x55e   : > { %v1679_v55 = vmul.f32 1.442695, %v1678_v53 }
 0x560   : > { %2868 = vpow2.f32 %v1679_v55 }
 0x56a   : > { %v2869_v56 = vpop.eup %2868 }
 0x56b   : > { %v2384_v58 = vadd.f32 -1.0, %v2869_v56 }
 0x56d   : > { %v1682_v60 = vsel %vm1677_vm13, %v1676_v49, %v2384_v58 }
 0x56e   : > { %v3485_v63 = vadd.f32 %v1682_v60, %v3118_v5  ;;  %v798_v5 = vld [vmem:[%s3615_s19 + $0x8] sm:$0xff] }
 0x56f   : > { %v2755_v4 = vpack.c.bf16 %v800_v3, %v798_v5 }
 0x570   : > { %2610 = vmatpush3.msra.mxu1 %v3485_v63 }
 0x571   : > { %2612 = vmatmul.mubr.msk.f32.vlgmr.msra.gmra.mrb[10].mxu1 %vm989_vm3, %v1684_v2  ;;  %2764 = vmatprep.subr.bf16.mxu1 %v3170_v18 }
 0x572   : > { %2766 = vmatpush1.bf16.msra.mxu1 %v3178_v21  ;;  %2027 = vmatprep.mubr.f32.mxu1 %v2938_v0 }
 0x573   : > { %2768 = vmatprep.subr.bf16.mxu1 %v3191_v25  ;;  %2756 = vmatprep.subr.bf16.mxu0 %v2755_v4  ;;  %v1689_v25 = vpop.permute.xlu1 %1688 }
 0x574   : > { %2758 = vmatpush1.bf16.msra.mxu0 %v2757_v23 }
 0x575   : > { %2760 = vmatprep.subr.bf16.mxu0 %v3170_v18 }
 0x644   : > { %v1760_v24 = vpop.f32.mrb[10].mxu1 }
 0x645   : > { %v1761_v27 = vadd.f32 %v1760_v24, %v1689_v25  ;;  %v2613_v61 = vpop.f32.mrb[11].mxu1 }
 0x647   : > { %v1770_v57 = vmul.f32 %v2386_v8, %v1761_v27  ;;  %v1772_v59 = vrot.slane %v1761_v27, 5  ;;  %v1848_v18 = vrot.slane %v1761_v27, 4 }
 0x649   : > { %2387 = vmatmul.mubr.msk.f32.vlgmr.msra.gmra.mrb[4].mxu0 %vm1174_vm7, %v1772_v59  ;;  %2391 = vmatmul.mubr.msk.f32.vlgmr.msra.gmra.mrb[12].mxu1 %vm1174_vm7, %v1770_v57 }
 0x64a   : > { %2762 = vmatpush1.bf16.msra.mxu0 %v3178_v21  ;;  %1915 = vmatprep.mubr.f32.mxu0 %v2938_v0 }
 0x64b   : > { %2770 = vmatpush3.bf16.msra.mxu1 %v3202_v29  ;;  %2614 = vmatprep.subr.mxu0 %v2938_v0 }
 0x64c   : > { %2772 = vmatprep.subr.bf16.mxu1 %v3204_v30 }
 0x64f   : > { %2774 = vmatpush3.bf16.msra.mxu1 %v3221_v35 }
 0x650   : > { %2776 = vmatprep.subr.bf16.mxu1 %v3224_v36 }
 0x651   : > { %2388 = vmatmul.mubr.msk.f32.vlgmr.msra.gmra.mrb[4].mxu0 %vm1174_vm7, %v1848_v18 }
 0x652   : > { %2616 = vmatprep.mubr.msk.f32.mxu0 %vm2939_vm0, %v2938_v0 }
 0x653   : > { %2778 = vmatpush3.bf16.msra.mxu1 %v3239_v41 }
 0x654   : > { %2780 = vmatprep.subr.bf16.mxu1 %v3242_v42 }
 0x657   : > { %2782 = vmatpush3.bf16.msra.mxu1 %v3257_v47 }
 0x658   : > { %2784 = vmatprep.subr.bf16.mxu1 %v3260_v48  ;;  %v1940_v48 = vrot.slane %v3159_v13, %v3269_v50 }
 0x65b   : > { %2786 = vmatpush3.bf16.msra.mxu1 %v3310_v14 }
 0x65c   : > { %2788 = vmatprep.subr.bf16.mxu1 %v3320_v19 }
 0x65f   : > { %2790 = vmatpush3.bf16.msra.mxu1 %v3335_v26 }
 0x660   : > { %2792 = vmatprep.subr.bf16.mxu1 %v3349_v34  ;;  %v1952_v34 = vpop.permute.xlu1 %1951 }
 0x663   : > { %2794 = vmatpush3.bf16.msra.mxu1 %v3358_v40 }
 0x664   : > { %2796 = vmatprep.subr.bf16.mxu1 %v3372_v46  ;;  %v1957_v46 = vrot.slane %v1952_v34, %v3269_v50 }
 0x667   : > { %2798 = vmatpush3.bf16.msra.mxu1 %v3378_v51 }
 0x71c   : > { %v2029_v0 = vpop.f32.mrb[12].mxu1 }
 0x71d   : > { %v2031_v21 = vpop.f32.mrb[13].mxu1 }
 0x724   : > { %v1917_v29 = vpop.f32.mrb[4].mxu0 }
 0x725   : > { %v1926_v30 = vmin.f32 %v1917_v29, 0.0  ;;  %v1919_v35 = vpop.f32.mrb[5].mxu0  ;;  %vm1924_vm14 = vcmp.gt.f32.partialorder %v1917_v29, 0.0 }
 0x726   : > { %v1927_v36 = vmin.f32 %v1919_v35, 0.0  ;;  %vm1925_vm15 = vcmp.gt.f32.partialorder %v1919_v35, 0.0 }
 0x727   : > { %v1928_v41 = vmul.f32 1.442695, %v1926_v30 }
 0x728   : > { %v1930_v42 = vmul.f32 1.442695, %v1927_v36 }
 0x729   : > { %2870 = vpow2.f32 %v1928_v41 }
 0x72a   : > { %2872 = vpow2.f32 %v1930_v42 }
 0x733   : > { %v2871_v47 = vpop.eup %2870 }
 0x734   : > { %v2873_v14 = vpop.eup %2872  ;;  %v2389_v19 = vadd.f32 -1.0, %v2871_v47 }
 0x735   : > { %v2390_v26 = vadd.f32 -1.0, %v2873_v14 }
 0x736   : > { %v1934_v40 = vsel %vm1924_vm14, %v1917_v29, %v2389_v19 }
 0x737   : > { %v1947_v51 = vmul.f32 %v1940_v48, %v1934_v40  ;;  %v1935_v1 = vsel %vm1925_vm15, %v1919_v35, %v2390_v26 }
 0x738   : > { %v1948_v10 = vmul.f32 %v3162_v15, %v1935_v1  ;;  %v2119_v15 = vpop.permute.xlu1 %2118 }
 0x739   : > { %v1958_v11 = vmul.f32 %v1957_v46, %v1947_v51 }
 0x73a   : > { %v1959_v16 = vmul.f32 %v1957_v46, %v1948_v10 }
 0x73b   : > { %v2037_v17 = vrot.slane %v1958_v11, %v3269_v50 }
 0x73c   : > { %v2041_v13 = vrot.slane %v1959_v16, %v3269_v50 }
 0x73d   : > { %v2042_v20 = vmul.f32 %v2037_v17, %v2029_v0 }
 0x73e   : > { %v2043_v22 = vmul.f32 %v2041_v13, %v2031_v21 }
 0x740   : > { %2108 = vmatprep.mubr.f32.mxu1 %v2043_v22 }
 0x741   : > { %2109 = vmatmul.mubr.f32.vlgmr.msra.gmra.mrb[14].mxu1 %v2042_v20 }
 0x814   : > { %v2583_v28 = vpop.f32.mrb[14].mxu1 }
 0x815   : > { %v2584_v31 = vpop.f32.mrb[15].mxu1 }
 0x816   : > { %v2585_v32 = vadd.f32 %v2584_v31, %v2583_v28 }
 0x818   : > { %2615 = vmatpush3.msk.msra.mxu0 %vm816_vm1, %v2585_v32 }
 0x819   : > { %2617 = vmatmul.mubr.msk.f32.vlgmr.msra.gmra.mrb[18].mxu0 %vm806_vm2, %v2114_v33 }
 0x8ec   : > { %v2193_v50 = vpop.f32.mrb[18].mxu0 }
 0x8ed   : > { %v2194_v37 = vadd.f32 %v2193_v50, %v2119_v15  ;;  %v2618_v38 = vpop.f32.mrb[19].mxu0 }
 0x8ef   : > { %v2197_v39 = vadd.f32 %v2194_v37, %v3485_v63 }
 0x8f1   : > { %2198 = vst.msk [vmem:[%s718_s25] sm:$0xff] %vm1174_vm7, %v2197_v39 }
 0x8f2   : > { %2887 = shalt.err (!%p2884_p3)
}
 0x8f3   : > { %s2888_s3 = scalar_lea.hbm %s3553_s1, 128  ;;  %s2892_s21 = scalar_lea.hbm %s3654_s20, 256 }
 0x8f4   : > { %p2889_p4 = scmp.ne.s32.totalorder %s3553_s1, %s2888_s3  ;;  %p2893_p9 = scmp.lt.u32.totalorder %s3553_s1, %s3654_s20 }
 0x8f5   : > { %p2894_p10 = scmp.lt.u32.totalorder %s2892_s21, %s2888_s3  ;;  %p2896_p12 = scmp.lt.u32.totalorder %s2888_s3, %s3553_s1 }
 0x8f6   : > { %p2890_p7 = pnand %p2889_p4, %p3086_p5 }
 0x8f7   : > { %p2895_p11 = por %p2894_p10, %p2893_p9 }
 0x8f8   : > { %p2891_p8 = pneg %p2890_p7 }
 0x8f9   : > { %p2897_p13 = por %p2896_p12, %p2895_p11 }
 0x8fb   : > { %p2898_p0 = pnand %p2897_p13, %p2891_p8 }
 0x8fd   : > { %2901 = shalt.err (!%p2898_p0)
}
 0x8fe   : > { %2803 = dma.vmem_to_hbm [thread:$0]  (%p3086_p5), %s3555_s26, 128, %s3553_s1, %s2200_s4  }
 0x8ff PF: > { %s3655_s15 = sld [smem:[#allocation7_spill]]  ;;  %s3656_s23 = sld [smem:[#allocation5_spill]] }
 0x905   : > { %p2809_p1 = scmp.ge.s32.totalorder %s3655_s15, 2  ;;  %s2225_s24 = sand.u32 1, %s3656_s23  }
 0x906   : > { %s2226_s2 = scalar_lea.sflag [#allocation3], %s2225_s24 }
 0x907   : > { %p2806_p2 = pnand %p2809_p1, %p3090_p6 }
 0x909   : > { %2919 = dma.done.wait (!%p2806_p2), %s2226_s2, 128  }
 0x90a   : > { %2921 = vsyncadd (!%p2806_p2), %s2226_s2, 4294967168  ;;  %s3658_s24 = sld [smem:[#allocation9_spill]]  ;;  %s3659_s3 = sld [smem:[#allocation6_spill]] }
 0x90b   : > { %s3660_s23 = sld [smem:[#allocation10_spill]]  ;;  %s3661_s1 = smov %s2928_s22 }
 0x910   : > { %p30_p3 = scmp.ge.s32.totalorder %s3658_s24, 4   ;;  %s3662_s22 = smov %s3659_s3 }
 0x912   :  { %32 = sbr.rel (!%p30_p3) target bundleno = 11 (0xb), region = 159 }
 0x919   :  { %2231 = vsyncpa [#allocation3], 1 }
 0x91a   :  { %2233 = vsyncpa [#allocation3 + $0x1], 1 }

</bundles_post_ra>
